<compile_context>
chip_gen: v6e
topology: v6e:2x2x1
jax: 0.10.0
libtpu: 0.0.40
codegen_flags: <defaults>
</compile_context>

<pallas_src>
import jax
import jax.numpy as jnp
from jax import lax
from jax.experimental import pallas as pl
from jax.experimental.pallas import tpu as pltpu

# ---------------- model hyper-parameters (tiny, synthetic) -----------------
VOCAB = 32
D_MODEL = 32
N_HEADS = 4
D_KV = 8                      # per-head dim
INNER = N_HEADS * D_KV        # 32  (T5 "inner_dim")
D_FF = 64
EPS = 1e-6
NEG = -1e9


# ------------------------- in-kernel helper math ----------------------------
def _rms(x):
    # T5 LayerNorm: no mean subtraction, no bias; gain is folded into the
    # next projection weight, so only the rsqrt normalization stays here.
    var = jnp.mean(x * x, axis=-1, keepdims=True)
    return x * lax.rsqrt(var + EPS)


def _attention(q, k, v, bias):
    """q: (Sq, INNER), k/v: (Sk, INNER), bias broadcastable to (Sq, Sk).

    All heads are computed inside one kernel invocation (unrolled static
    Python loop — no per-head grid steps / DMAs).  T5 does NOT scale scores.
    """
    outs = []
    for h in range(N_HEADS):
        sl = slice(h * D_KV, (h + 1) * D_KV)
        qh, kh, vh = q[:, sl], k[:, sl], v[:, sl]
        # contract the last dims of q and k directly (no explicit transpose)
        s = lax.dot_general(qh, kh, (((1,), (1,)), ((), ())),
                            preferred_element_type=jnp.float32)
        s = s + bias
        m = jnp.max(s, axis=-1, keepdims=True)
        p = jnp.exp(s - m)
        denom = jnp.sum(p, axis=-1, keepdims=True)
        p = p * pl.reciprocal(denom, approx=True)
        outs.append(jnp.dot(p, vh, preferred_element_type=jnp.float32))
    return jnp.concatenate(outs, axis=1)            # (Sq, INNER)


# ----------------------------- fused kernel ---------------------------------
def _t5_fused_kernel(x_ref, y_ref, mask_ref,
                     enc_sa_wqkv_ref, enc_sa_wo_ref,
                     enc_ff_wi_ref, enc_ff_wo_ref,
                     dec_sa_wqkv_ref, dec_sa_wo_ref,
                     dec_ca_wq_ref, dec_ca_wkv_ref, dec_ca_wo_ref,
                     dec_ff_wi_ref, dec_ff_wo_ref,
                     lm_w_ref,
                     logits_ref):
    f32 = jnp.float32
    sd = y_ref.shape[0]

    # -------- additive masks, built in-kernel (nothing materialized in HBM) --
    enc_bias = (1.0 - mask_ref[...]) * NEG                      # (1, Se)
    row = lax.broadcasted_iota(jnp.int32, (sd, sd), 0)
    col = lax.broadcasted_iota(jnp.int32, (sd, sd), 1)
    causal_bias = jnp.where(row >= col, 0.0, NEG)               # (Sd, Sd)

    # ------------------------------ encoder ---------------------------------
    x = x_ref[...]                                              # (Se, D)
    # self-attention (fused QKV projection; LN gain folded into wqkv)
    qkv = jnp.dot(_rms(x), enc_sa_wqkv_ref[...], preferred_element_type=f32)
    o = _attention(qkv[:, :INNER], qkv[:, INNER:2 * INNER], qkv[:, 2 * INNER:],
                   enc_bias)
    x = x + jnp.dot(o, enc_sa_wo_ref[...], preferred_element_type=f32)
    # FFN (LN gain folded into wi)
    h = jnp.maximum(
        jnp.dot(_rms(x), enc_ff_wi_ref[...], preferred_element_type=f32), 0.0)
    x = x + jnp.dot(h, enc_ff_wo_ref[...], preferred_element_type=f32)
    # encoder final LN: gain folded into cross-attention K/V weights
    enc_out = _rms(x)                                           # (Se, D)

    # ------------------------------ decoder ---------------------------------
    y = y_ref[...]                                              # (Sd, D)
    # causal self-attention
    qkv = jnp.dot(_rms(y), dec_sa_wqkv_ref[...], preferred_element_type=f32)
    o = _attention(qkv[:, :INNER], qkv[:, INNER:2 * INNER], qkv[:, 2 * INNER:],
                   causal_bias)
    y = y + jnp.dot(o, dec_sa_wo_ref[...], preferred_element_type=f32)
    # cross-attention (fused K/V projection over encoder output)
    q = jnp.dot(_rms(y), dec_ca_wq_ref[...], preferred_element_type=f32)
    kv = jnp.dot(enc_out, dec_ca_wkv_ref[...], preferred_element_type=f32)
    o = _attention(q, kv[:, :INNER], kv[:, INNER:], enc_bias)
    y = y + jnp.dot(o, dec_ca_wo_ref[...], preferred_element_type=f32)
    # FFN
    h = jnp.maximum(
        jnp.dot(_rms(y), dec_ff_wi_ref[...], preferred_element_type=f32), 0.0)
    y = y + jnp.dot(h, dec_ff_wo_ref[...], preferred_element_type=f32)

    # final LN gain + d_model**-0.5 + tied embedding all folded into lm_w
    logits_ref[...] = jnp.dot(_rms(y), lm_w_ref[...],
                              preferred_element_type=f32)


# ---------------------- weight preprocessing (once) --------------------------
def prepare_params(params):
    """Fold RMSNorm gains into the following projections, fuse QKV weights and
    pre-build the tied LM-head weight.  Done once, outside the per-call trace."""
    emb = params["embed"]

    def fold(g, w):
        return g[:, None] * w

    enc_sa, enc_ff = params["enc"]["sa"], params["enc"]["ff"]
    dec_sa, dec_ca, dec_ff = (params["dec"]["sa"], params["dec"]["ca"],
                              params["dec"]["ff"])
    g_ef = params["enc"]["final_ln"]
    g_df = params["dec"]["final_ln"]

    return {
        "embed": emb,
        "enc_sa_wqkv": jnp.concatenate(
            [fold(enc_sa["ln"], enc_sa[k]) for k in ("wq", "wk", "wv")], axis=1),
        "enc_sa_wo": enc_sa["wo"],
        "enc_ff_wi": fold(enc_ff["ln"], enc_ff["wi"]),
        "enc_ff_wo": enc_ff["wo"],
        "dec_sa_wqkv": jnp.concatenate(
            [fold(dec_sa["ln"], dec_sa[k]) for k in ("wq", "wk", "wv")], axis=1),
        "dec_sa_wo": dec_sa["wo"],
        "dec_ca_wq": fold(dec_ca["ln"], dec_ca["wq"]),
        # encoder final-LN gain acts on cross-attn K/V inputs -> fold here
        "dec_ca_wkv": jnp.concatenate(
            [fold(g_ef, dec_ca["wk"]), fold(g_ef, dec_ca["wv"])], axis=1),
        "dec_ca_wo": dec_ca["wo"],
        "dec_ff_wi": fold(dec_ff["ln"], dec_ff["wi"]),
        "dec_ff_wo": dec_ff["wo"],
        # tied LM head: decoder final-LN gain and d_model**-0.5 pre-folded
        "lm_w": (g_df * (D_MODEL ** -0.5))[:, None] * emb.T,     # (D, V)
    }


_W_NAMES = ("enc_sa_wqkv", "enc_sa_wo", "enc_ff_wi", "enc_ff_wo",
            "dec_sa_wqkv", "dec_sa_wo",
            "dec_ca_wq", "dec_ca_wkv", "dec_ca_wo",
            "dec_ff_wi", "dec_ff_wo", "lm_w")


# ------------------------------ full forward --------------------------------
@jax.jit
def t5_forward(prep, input_ids, attention_mask, decoder_input_ids):
    b, se = input_ids.shape
    sd = decoder_input_ids.shape[1]
    emb = prep["embed"]

    # Embedding gathers stay in XLA (see TODO above); everything downstream is
    # one fused Pallas call.
    x = emb[input_ids]                                           # (B, Se, D)
    y = emb[decoder_input_ids]                                   # (B, Sd, D)
    mask = attention_mask.astype(jnp.float32).reshape(b, 1, se)  # (B, 1, Se)

    weights = [prep[n] for n in _W_NAMES]
    # constant block index -> weights stay resident in VMEM across the grid
    w_specs = [pl.BlockSpec(w.shape, lambda i: (0, 0)) for w in weights]

    logits = pl.pallas_call(
        _t5_fused_kernel,
        out_shape=jax.ShapeDtypeStruct((b, sd, VOCAB), jnp.float32),
        grid=(b,),
        in_specs=[
            pl.BlockSpec((None, se, D_MODEL), lambda i: (i, 0, 0)),
            pl.BlockSpec((None, sd, D_MODEL), lambda i: (i, 0, 0)),
            pl.BlockSpec((None, 1, se), lambda i: (i, 0, 0)),
            *w_specs,
        ],
        out_specs=pl.BlockSpec((None, sd, VOCAB), lambda i: (i, 0, 0)),
        compiler_params=pltpu.CompilerParams(
            dimension_semantics=("parallel",)),
    )(x, y, mask, *weights)
    return logits


# ---------------------------- parameter init ---------------------------------
def init_params(key):
    keys = iter(jax.random.split(key, 64))

    def w(shape, scale=0.05):
        return jax.random.normal(next(keys), shape, jnp.float32) * scale

    def attn_params():
        return {
            "ln": jnp.ones((D_MODEL,), jnp.float32),
            "wq": w((D_MODEL, INNER)),
            "wk": w((D_MODEL, INNER)),
            "wv": w((D_MODEL, INNER)),
            "wo": w((INNER, D_MODEL)),
        }

    def ffn_params():
        return {
            "ln": jnp.ones((D_MODEL,), jnp.float32),
            "wi": w((D_MODEL, D_FF)),
            "wo": w((D_FF, D_MODEL)),
        }

    return {
        "embed": w((VOCAB, D_MODEL), scale=1.0),
        "enc": {
            "sa": attn_params(),
            "ff": ffn_params(),
            "final_ln": jnp.ones((D_MODEL,), jnp.float32),
        },
        "dec": {
            "sa": attn_params(),
            "ca": attn_params(),
            "ff": ffn_params(),
            "final_ln": jnp.ones((D_MODEL,), jnp.float32),
        },
    }


# --------------------------------- main --------------------------------------
if __name__ == "__main__":
    key = jax.random.PRNGKey(0)
    k_param, k_in, k_dec = jax.random.split(key, 3)

    params = init_params(k_param)
    prep = prepare_params(params)          # one-time weight folding / fusion

    B, S_ENC, S_DEC = 2, 8, 8
    input_ids = jax.random.randint(k_in, (B, S_ENC), 0, VOCAB, jnp.int32)
    decoder_input_ids = jax.random.randint(k_dec, (B, S_DEC), 0, VOCAB,
                                           jnp.int32)
    attention_mask = jnp.ones((B, S_ENC), jnp.int32)
    attention_mask = attention_mask.at[1, -2:].set(0)   # some padding

    logits = t5_forward(prep, input_ids, attention_mask, decoder_input_ids)
    jax.block_until_ready(logits)

    assert logits.shape == (B, S_DEC, VOCAB)
    assert logits.dtype == jnp.float32
    assert bool(jnp.all(jnp.isfinite(logits)))
    print("KERNEL_OK")
</pallas_src>

<mosaic_0001>
module attributes {stable_mosaic.version = 11 : i64} {
  func.func @_t5_fused_kernel(%arg0: i32, %arg1: memref<1x8x32xf32, #tpu.memory_space<vmem>>, %arg2: memref<1x8x32xf32, #tpu.memory_space<vmem>>, %arg3: memref<1x1x8xf32, #tpu.memory_space<vmem>>, %arg4: memref<32x96xf32, #tpu.memory_space<vmem>>, %arg5: memref<32x32xf32, #tpu.memory_space<vmem>>, %arg6: memref<32x64xf32, #tpu.memory_space<vmem>>, %arg7: memref<64x32xf32, #tpu.memory_space<vmem>>, %arg8: memref<32x96xf32, #tpu.memory_space<vmem>>, %arg9: memref<32x32xf32, #tpu.memory_space<vmem>>, %arg10: memref<32x32xf32, #tpu.memory_space<vmem>>, %arg11: memref<32x64xf32, #tpu.memory_space<vmem>>, %arg12: memref<32x32xf32, #tpu.memory_space<vmem>>, %arg13: memref<32x64xf32, #tpu.memory_space<vmem>>, %arg14: memref<64x32xf32, #tpu.memory_space<vmem>>, %arg15: memref<32x32xf32, #tpu.memory_space<vmem>>, %arg16: memref<1x8x32xf32, #tpu.memory_space<vmem>>) attributes {dimension_semantics = [#tpu.dimension_semantics<parallel>], iteration_bounds = array<i64: 2>, scalar_prefetch = 0 : i64, scratch_operands = 0 : i64, tpu.core_type = #tpu.core_type<tc>, window_params = [{transform_indices = @transform_0, window_bounds = array<i64: 1, 8, 32>}, {transform_indices = @transform_1, window_bounds = array<i64: 1, 8, 32>}, {transform_indices = @transform_2, window_bounds = array<i64: 1, 1, 8>}, {pipeline_mode = #tpu.pipeline_mode<synchronous>, transform_indices = @transform_3, window_bounds = array<i64: 32, 96>}, {pipeline_mode = #tpu.pipeline_mode<synchronous>, transform_indices = @transform_4, window_bounds = array<i64: 32, 32>}, {pipeline_mode = #tpu.pipeline_mode<synchronous>, transform_indices = @transform_5, window_bounds = array<i64: 32, 64>}, {pipeline_mode = #tpu.pipeline_mode<synchronous>, transform_indices = @transform_6, window_bounds = array<i64: 64, 32>}, {pipeline_mode = #tpu.pipeline_mode<synchronous>, transform_indices = @transform_7, window_bounds = array<i64: 32, 96>}, {pipeline_mode = #tpu.pipeline_mode<synchronous>, transform_indices = @transform_8, window_bounds = array<i64: 32, 32>}, {pipeline_mode = #tpu.pipeline_mode<synchronous>, transform_indices = @transform_9, window_bounds = array<i64: 32, 32>}, {pipeline_mode = #tpu.pipeline_mode<synchronous>, transform_indices = @transform_10, window_bounds = array<i64: 32, 64>}, {pipeline_mode = #tpu.pipeline_mode<synchronous>, transform_indices = @transform_11, window_bounds = array<i64: 32, 32>}, {pipeline_mode = #tpu.pipeline_mode<synchronous>, transform_indices = @transform_12, window_bounds = array<i64: 32, 64>}, {pipeline_mode = #tpu.pipeline_mode<synchronous>, transform_indices = @transform_13, window_bounds = array<i64: 64, 32>}, {pipeline_mode = #tpu.pipeline_mode<synchronous>, transform_indices = @transform_14, window_bounds = array<i64: 32, 32>}, {transform_indices = @transform_15, window_bounds = array<i64: 1, 8, 32>}]} {
    %c0 = arith.constant 0 : index
    %c0_0 = arith.constant 0 : index
    %c0_1 = arith.constant 0 : index
    %0 = vector.load %arg3[%c0, %c0_0, %c0_1] : memref<1x1x8xf32, #tpu.memory_space<vmem>>, vector<1x1x8xf32>
    %1 = vector.shape_cast %0 : vector<1x1x8xf32> to vector<1x8xf32>
    %cst = arith.constant 1.000000e+00 : f32
    %2 = vector.broadcast %cst : f32 to vector<1x8xf32>
    %3 = arith.subf %2, %1 : vector<1x8xf32>
    %cst_2 = arith.constant -1.000000e+09 : f32
    %4 = vector.broadcast %cst_2 : f32 to vector<1x8xf32>
    %5 = arith.mulf %3, %4 : vector<1x8xf32>
    %6 = tpu.iota {dimensions = array<i32: 0>} : vector<8x8xi32>
    %7 = tpu.iota {dimensions = array<i32: 1>} : vector<8x8xi32>
    %8 = arith.cmpi sge, %6, %7 : vector<8x8xi32>
    %cst_3 = arith.constant 0.000000e+00 : f32
    %cst_4 = arith.constant -1.000000e+09 : f32
    %9 = vector.broadcast %cst_3 : f32 to vector<8x8xf32>
    %10 = vector.broadcast %cst_4 : f32 to vector<8x8xf32>
    %11 = arith.select %8, %9, %10 : vector<8x8xi1>, vector<8x8xf32>
    %c0_5 = arith.constant 0 : index
    %c0_6 = arith.constant 0 : index
    %c0_7 = arith.constant 0 : index
    %12 = vector.load %arg1[%c0_5, %c0_6, %c0_7] : memref<1x8x32xf32, #tpu.memory_space<vmem>>, vector<1x8x32xf32>
    %13 = vector.shape_cast %12 : vector<1x8x32xf32> to vector<8x32xf32>
    %14 = arith.mulf %13, %13 : vector<8x32xf32>
    %cst_8 = arith.constant dense<0.000000e+00> : vector<8xf32>
    %15 = vector.multi_reduction <add>, %14, %cst_8 [1] : vector<8x32xf32> to vector<8xf32>
    %16 = vector.shape_cast %15 : vector<8xf32> to vector<8x1xf32>
    %cst_9 = arith.constant 3.200000e+01 : f32
    %17 = vector.broadcast %cst_9 : f32 to vector<8x1xf32>
    %18 = arith.divf %16, %17 : vector<8x1xf32>
    %cst_10 = arith.constant 9.99999997E-7 : f32
    %19 = vector.broadcast %cst_10 : f32 to vector<8x1xf32>
    %20 = arith.addf %18, %19 : vector<8x1xf32>
    %21 = math.rsqrt %20 : vector<8x1xf32>
    %22 = vector.broadcast %21 : vector<8x1xf32> to vector<8x32xf32>
    %23 = arith.mulf %13, %22 : vector<8x32xf32>
    %c0_11 = arith.constant 0 : index
    %c0_12 = arith.constant 0 : index
    %24 = vector.load %arg4[%c0_11, %c0_12] : memref<32x96xf32, #tpu.memory_space<vmem>>, vector<32x96xf32>
    %cst_13 = arith.constant dense<0.000000e+00> : vector<8x96xf32>
    %25 = tpu.matmul %23, %24, %cst_13 {dimension_numbers = #tpu.dot_dimension_numbers<[1], [0], [0], [1], [0, 0, 1, 1], [], []>} : vector<8x32xf32>, vector<32x96xf32>, vector<8x96xf32> -> vector<8x96xf32>
    %26 = vector.extract_strided_slice %25 {offsets = [0, 0], sizes = [8, 32], strides = [1, 1]} : vector<8x96xf32> to vector<8x32xf32>
    %27 = vector.extract_strided_slice %25 {offsets = [0, 32], sizes = [8, 32], strides = [1, 1]} : vector<8x96xf32> to vector<8x32xf32>
    %28 = vector.extract_strided_slice %25 {offsets = [0, 64], sizes = [8, 32], strides = [1, 1]} : vector<8x96xf32> to vector<8x32xf32>
    %29 = vector.extract_strided_slice %26 {offsets = [0, 0], sizes = [8, 8], strides = [1, 1]} : vector<8x32xf32> to vector<8x8xf32>
    %30 = vector.extract_strided_slice %27 {offsets = [0, 0], sizes = [8, 8], strides = [1, 1]} : vector<8x32xf32> to vector<8x8xf32>
    %31 = vector.extract_strided_slice %28 {offsets = [0, 0], sizes = [8, 8], strides = [1, 1]} : vector<8x32xf32> to vector<8x8xf32>
    %cst_14 = arith.constant dense<0.000000e+00> : vector<8x8xf32>
    %32 = tpu.matmul %29, %30, %cst_14 {dimension_numbers = #tpu.dot_dimension_numbers<[1], [1], [0], [0], [0, 0, 1, 0], [], []>} : vector<8x8xf32>, vector<8x8xf32>, vector<8x8xf32> -> vector<8x8xf32>
    %33 = vector.broadcast %5 : vector<1x8xf32> to vector<8x8xf32>
    %34 = arith.addf %32, %33 : vector<8x8xf32>
    %cst_15 = arith.constant dense<0xFF800000> : vector<8xf32>
    %35 = vector.multi_reduction <maximumf>, %34, %cst_15 [1] : vector<8x8xf32> to vector<8xf32>
    %36 = vector.shape_cast %35 : vector<8xf32> to vector<8x1xf32>
    %37 = vector.broadcast %36 : vector<8x1xf32> to vector<8x8xf32>
    %38 = arith.subf %34, %37 : vector<8x8xf32>
    %39 = math.exp %38 : vector<8x8xf32>
    %cst_16 = arith.constant dense<0.000000e+00> : vector<8xf32>
    %40 = vector.multi_reduction <add>, %39, %cst_16 [1] : vector<8x8xf32> to vector<8xf32>
    %41 = vector.shape_cast %40 : vector<8xf32> to vector<8x1xf32>
    %42 = tpu.reciprocal %41 {approx = true} : vector<8x1xf32> -> vector<8x1xf32>
    %43 = vector.broadcast %42 : vector<8x1xf32> to vector<8x8xf32>
    %44 = arith.mulf %39, %43 : vector<8x8xf32>
    %cst_17 = arith.constant dense<0.000000e+00> : vector<8x8xf32>
    %45 = tpu.matmul %44, %31, %cst_17 {dimension_numbers = #tpu.dot_dimension_numbers<[1], [0], [0], [1], [0, 0, 1, 1], [], []>} : vector<8x8xf32>, vector<8x8xf32>, vector<8x8xf32> -> vector<8x8xf32>
    %46 = vector.extract_strided_slice %26 {offsets = [0, 8], sizes = [8, 8], strides = [1, 1]} : vector<8x32xf32> to vector<8x8xf32>
    %47 = vector.extract_strided_slice %27 {offsets = [0, 8], sizes = [8, 8], strides = [1, 1]} : vector<8x32xf32> to vector<8x8xf32>
    %48 = vector.extract_strided_slice %28 {offsets = [0, 8], sizes = [8, 8], strides = [1, 1]} : vector<8x32xf32> to vector<8x8xf32>
    %cst_18 = arith.constant dense<0.000000e+00> : vector<8x8xf32>
    %49 = tpu.matmul %46, %47, %cst_18 {dimension_numbers = #tpu.dot_dimension_numbers<[1], [1], [0], [0], [0, 0, 1, 0], [], []>} : vector<8x8xf32>, vector<8x8xf32>, vector<8x8xf32> -> vector<8x8xf32>
    %50 = vector.broadcast %5 : vector<1x8xf32> to vector<8x8xf32>
    %51 = arith.addf %49, %50 : vector<8x8xf32>
    %cst_19 = arith.constant dense<0xFF800000> : vector<8xf32>
    %52 = vector.multi_reduction <maximumf>, %51, %cst_19 [1] : vector<8x8xf32> to vector<8xf32>
    %53 = vector.shape_cast %52 : vector<8xf32> to vector<8x1xf32>
    %54 = vector.broadcast %53 : vector<8x1xf32> to vector<8x8xf32>
    %55 = arith.subf %51, %54 : vector<8x8xf32>
    %56 = math.exp %55 : vector<8x8xf32>
    %cst_20 = arith.constant dense<0.000000e+00> : vector<8xf32>
    %57 = vector.multi_reduction <add>, %56, %cst_20 [1] : vector<8x8xf32> to vector<8xf32>
    %58 = vector.shape_cast %57 : vector<8xf32> to vector<8x1xf32>
    %59 = tpu.reciprocal %58 {approx = true} : vector<8x1xf32> -> vector<8x1xf32>
    %60 = vector.broadcast %59 : vector<8x1xf32> to vector<8x8xf32>
    %61 = arith.mulf %56, %60 : vector<8x8xf32>
    %cst_21 = arith.constant dense<0.000000e+00> : vector<8x8xf32>
    %62 = tpu.matmul %61, %48, %cst_21 {dimension_numbers = #tpu.dot_dimension_numbers<[1], [0], [0], [1], [0, 0, 1, 1], [], []>} : vector<8x8xf32>, vector<8x8xf32>, vector<8x8xf32> -> vector<8x8xf32>
    %63 = vector.extract_strided_slice %26 {offsets = [0, 16], sizes = [8, 8], strides = [1, 1]} : vector<8x32xf32> to vector<8x8xf32>
    %64 = vector.extract_strided_slice %27 {offsets = [0, 16], sizes = [8, 8], strides = [1, 1]} : vector<8x32xf32> to vector<8x8xf32>
    %65 = vector.extract_strided_slice %28 {offsets = [0, 16], sizes = [8, 8], strides = [1, 1]} : vector<8x32xf32> to vector<8x8xf32>
    %cst_22 = arith.constant dense<0.000000e+00> : vector<8x8xf32>
    %66 = tpu.matmul %63, %64, %cst_22 {dimension_numbers = #tpu.dot_dimension_numbers<[1], [1], [0], [0], [0, 0, 1, 0], [], []>} : vector<8x8xf32>, vector<8x8xf32>, vector<8x8xf32> -> vector<8x8xf32>
    %67 = vector.broadcast %5 : vector<1x8xf32> to vector<8x8xf32>
    %68 = arith.addf %66, %67 : vector<8x8xf32>
    %cst_23 = arith.constant dense<0xFF800000> : vector<8xf32>
    %69 = vector.multi_reduction <maximumf>, %68, %cst_23 [1] : vector<8x8xf32> to vector<8xf32>
    %70 = vector.shape_cast %69 : vector<8xf32> to vector<8x1xf32>
    %71 = vector.broadcast %70 : vector<8x1xf32> to vector<8x8xf32>
    %72 = arith.subf %68, %71 : vector<8x8xf32>
    %73 = math.exp %72 : vector<8x8xf32>
    %cst_24 = arith.constant dense<0.000000e+00> : vector<8xf32>
    %74 = vector.multi_reduction <add>, %73, %cst_24 [1] : vector<8x8xf32> to vector<8xf32>
    %75 = vector.shape_cast %74 : vector<8xf32> to vector<8x1xf32>
    %76 = tpu.reciprocal %75 {approx = true} : vector<8x1xf32> -> vector<8x1xf32>
    %77 = vector.broadcast %76 : vector<8x1xf32> to vector<8x8xf32>
    %78 = arith.mulf %73, %77 : vector<8x8xf32>
    %cst_25 = arith.constant dense<0.000000e+00> : vector<8x8xf32>
    %79 = tpu.matmul %78, %65, %cst_25 {dimension_numbers = #tpu.dot_dimension_numbers<[1], [0], [0], [1], [0, 0, 1, 1], [], []>} : vector<8x8xf32>, vector<8x8xf32>, vector<8x8xf32> -> vector<8x8xf32>
    %80 = vector.extract_strided_slice %26 {offsets = [0, 24], sizes = [8, 8], strides = [1, 1]} : vector<8x32xf32> to vector<8x8xf32>
    %81 = vector.extract_strided_slice %27 {offsets = [0, 24], sizes = [8, 8], strides = [1, 1]} : vector<8x32xf32> to vector<8x8xf32>
    %82 = vector.extract_strided_slice %28 {offsets = [0, 24], sizes = [8, 8], strides = [1, 1]} : vector<8x32xf32> to vector<8x8xf32>
    %cst_26 = arith.constant dense<0.000000e+00> : vector<8x8xf32>
    %83 = tpu.matmul %80, %81, %cst_26 {dimension_numbers = #tpu.dot_dimension_numbers<[1], [1], [0], [0], [0, 0, 1, 0], [], []>} : vector<8x8xf32>, vector<8x8xf32>, vector<8x8xf32> -> vector<8x8xf32>
    %84 = vector.broadcast %5 : vector<1x8xf32> to vector<8x8xf32>
    %85 = arith.addf %83, %84 : vector<8x8xf32>
    %cst_27 = arith.constant dense<0xFF800000> : vector<8xf32>
    %86 = vector.multi_reduction <maximumf>, %85, %cst_27 [1] : vector<8x8xf32> to vector<8xf32>
    %87 = vector.shape_cast %86 : vector<8xf32> to vector<8x1xf32>
    %88 = vector.broadcast %87 : vector<8x1xf32> to vector<8x8xf32>
    %89 = arith.subf %85, %88 : vector<8x8xf32>
    %90 = math.exp %89 : vector<8x8xf32>
    %cst_28 = arith.constant dense<0.000000e+00> : vector<8xf32>
    %91 = vector.multi_reduction <add>, %90, %cst_28 [1] : vector<8x8xf32> to vector<8xf32>
    %92 = vector.shape_cast %91 : vector<8xf32> to vector<8x1xf32>
    %93 = tpu.reciprocal %92 {approx = true} : vector<8x1xf32> -> vector<8x1xf32>
    %94 = vector.broadcast %93 : vector<8x1xf32> to vector<8x8xf32>
    %95 = arith.mulf %90, %94 : vector<8x8xf32>
    %cst_29 = arith.constant dense<0.000000e+00> : vector<8x8xf32>
    %96 = tpu.matmul %95, %82, %cst_29 {dimension_numbers = #tpu.dot_dimension_numbers<[1], [0], [0], [1], [0, 0, 1, 1], [], []>} : vector<8x8xf32>, vector<8x8xf32>, vector<8x8xf32> -> vector<8x8xf32>
    %97 = tpu.concatenate %45, %62, %79, %96 in 1 : vector<8x8xf32>, vector<8x8xf32>, vector<8x8xf32>, vector<8x8xf32> -> vector<8x32xf32>
    %c0_30 = arith.constant 0 : index
    %c0_31 = arith.constant 0 : index
    %98 = vector.load %arg5[%c0_30, %c0_31] : memref<32x32xf32, #tpu.memory_space<vmem>>, vector<32x32xf32>
    %cst_32 = arith.constant dense<0.000000e+00> : vector<8x32xf32>
    %99 = tpu.matmul %97, %98, %cst_32 {dimension_numbers = #tpu.dot_dimension_numbers<[1], [0], [0], [1], [0, 0, 1, 1], [], []>} : vector<8x32xf32>, vector<32x32xf32>, vector<8x32xf32> -> vector<8x32xf32>
    %100 = arith.addf %13, %99 : vector<8x32xf32>
    %101 = arith.mulf %100, %100 : vector<8x32xf32>
    %cst_33 = arith.constant dense<0.000000e+00> : vector<8xf32>
    %102 = vector.multi_reduction <add>, %101, %cst_33 [1] : vector<8x32xf32> to vector<8xf32>
    %103 = vector.shape_cast %102 : vector<8xf32> to vector<8x1xf32>
    %cst_34 = arith.constant 3.200000e+01 : f32
    %104 = vector.broadcast %cst_34 : f32 to vector<8x1xf32>
    %105 = arith.divf %103, %104 : vector<8x1xf32>
    %cst_35 = arith.constant 9.99999997E-7 : f32
    %106 = vector.broadcast %cst_35 : f32 to vector<8x1xf32>
    %107 = arith.addf %105, %106 : vector<8x1xf32>
    %108 = math.rsqrt %107 : vector<8x1xf32>
    %109 = vector.broadcast %108 : vector<8x1xf32> to vector<8x32xf32>
    %110 = arith.mulf %100, %109 : vector<8x32xf32>
    %c0_36 = arith.constant 0 : index
    %c0_37 = arith.constant 0 : index
    %111 = vector.load %arg6[%c0_36, %c0_37] : memref<32x64xf32, #tpu.memory_space<vmem>>, vector<32x64xf32>
    %cst_38 = arith.constant dense<0.000000e+00> : vector<8x64xf32>
    %112 = tpu.matmul %110, %111, %cst_38 {dimension_numbers = #tpu.dot_dimension_numbers<[1], [0], [0], [1], [0, 0, 1, 1], [], []>} : vector<8x32xf32>, vector<32x64xf32>, vector<8x64xf32> -> vector<8x64xf32>
    %cst_39 = arith.constant 0.000000e+00 : f32
    %113 = vector.broadcast %cst_39 : f32 to vector<8x64xf32>
    %114 = arith.maximumf %112, %113 : vector<8x64xf32>
    %c0_40 = arith.constant 0 : index
    %c0_41 = arith.constant 0 : index
    %115 = vector.load %arg7[%c0_40, %c0_41] : memref<64x32xf32, #tpu.memory_space<vmem>>, vector<64x32xf32>
    %cst_42 = arith.constant dense<0.000000e+00> : vector<8x32xf32>
    %116 = tpu.matmul %114, %115, %cst_42 {dimension_numbers = #tpu.dot_dimension_numbers<[1], [0], [0], [1], [0, 0, 1, 1], [], []>} : vector<8x64xf32>, vector<64x32xf32>, vector<8x32xf32> -> vector<8x32xf32>
    %117 = arith.addf %100, %116 : vector<8x32xf32>
    %118 = arith.mulf %117, %117 : vector<8x32xf32>
    %cst_43 = arith.constant dense<0.000000e+00> : vector<8xf32>
    %119 = vector.multi_reduction <add>, %118, %cst_43 [1] : vector<8x32xf32> to vector<8xf32>
    %120 = vector.shape_cast %119 : vector<8xf32> to vector<8x1xf32>
    %cst_44 = arith.constant 3.200000e+01 : f32
    %121 = vector.broadcast %cst_44 : f32 to vector<8x1xf32>
    %122 = arith.divf %120, %121 : vector<8x1xf32>
    %cst_45 = arith.constant 9.99999997E-7 : f32
    %123 = vector.broadcast %cst_45 : f32 to vector<8x1xf32>
    %124 = arith.addf %122, %123 : vector<8x1xf32>
    %125 = math.rsqrt %124 : vector<8x1xf32>
    %126 = vector.broadcast %125 : vector<8x1xf32> to vector<8x32xf32>
    %127 = arith.mulf %117, %126 : vector<8x32xf32>
    %c0_46 = arith.constant 0 : index
    %c0_47 = arith.constant 0 : index
    %c0_48 = arith.constant 0 : index
    %128 = vector.load %arg2[%c0_46, %c0_47, %c0_48] : memref<1x8x32xf32, #tpu.memory_space<vmem>>, vector<1x8x32xf32>
    %129 = vector.shape_cast %128 : vector<1x8x32xf32> to vector<8x32xf32>
    %130 = arith.mulf %129, %129 : vector<8x32xf32>
    %cst_49 = arith.constant dense<0.000000e+00> : vector<8xf32>
    %131 = vector.multi_reduction <add>, %130, %cst_49 [1] : vector<8x32xf32> to vector<8xf32>
    %132 = vector.shape_cast %131 : vector<8xf32> to vector<8x1xf32>
    %cst_50 = arith.constant 3.200000e+01 : f32
    %133 = vector.broadcast %cst_50 : f32 to vector<8x1xf32>
    %134 = arith.divf %132, %133 : vector<8x1xf32>
    %cst_51 = arith.constant 9.99999997E-7 : f32
    %135 = vector.broadcast %cst_51 : f32 to vector<8x1xf32>
    %136 = arith.addf %134, %135 : vector<8x1xf32>
    %137 = math.rsqrt %136 : vector<8x1xf32>
    %138 = vector.broadcast %137 : vector<8x1xf32> to vector<8x32xf32>
    %139 = arith.mulf %129, %138 : vector<8x32xf32>
    %c0_52 = arith.constant 0 : index
    %c0_53 = arith.constant 0 : index
    %140 = vector.load %arg8[%c0_52, %c0_53] : memref<32x96xf32, #tpu.memory_space<vmem>>, vector<32x96xf32>
    %cst_54 = arith.constant dense<0.000000e+00> : vector<8x96xf32>
    %141 = tpu.matmul %139, %140, %cst_54 {dimension_numbers = #tpu.dot_dimension_numbers<[1], [0], [0], [1], [0, 0, 1, 1], [], []>} : vector<8x32xf32>, vector<32x96xf32>, vector<8x96xf32> -> vector<8x96xf32>
    %142 = vector.extract_strided_slice %141 {offsets = [0, 0], sizes = [8, 32], strides = [1, 1]} : vector<8x96xf32> to vector<8x32xf32>
    %143 = vector.extract_strided_slice %141 {offsets = [0, 32], sizes = [8, 32], strides = [1, 1]} : vector<8x96xf32> to vector<8x32xf32>
    %144 = vector.extract_strided_slice %141 {offsets = [0, 64], sizes = [8, 32], strides = [1, 1]} : vector<8x96xf32> to vector<8x32xf32>
    %145 = vector.extract_strided_slice %142 {offsets = [0, 0], sizes = [8, 8], strides = [1, 1]} : vector<8x32xf32> to vector<8x8xf32>
    %146 = vector.extract_strided_slice %143 {offsets = [0, 0], sizes = [8, 8], strides = [1, 1]} : vector<8x32xf32> to vector<8x8xf32>
    %147 = vector.extract_strided_slice %144 {offsets = [0, 0], sizes = [8, 8], strides = [1, 1]} : vector<8x32xf32> to vector<8x8xf32>
    %cst_55 = arith.constant dense<0.000000e+00> : vector<8x8xf32>
    %148 = tpu.matmul %145, %146, %cst_55 {dimension_numbers = #tpu.dot_dimension_numbers<[1], [1], [0], [0], [0, 0, 1, 0], [], []>} : vector<8x8xf32>, vector<8x8xf32>, vector<8x8xf32> -> vector<8x8xf32>
    %149 = arith.addf %148, %11 : vector<8x8xf32>
    %cst_56 = arith.constant dense<0xFF800000> : vector<8xf32>
    %150 = vector.multi_reduction <maximumf>, %149, %cst_56 [1] : vector<8x8xf32> to vector<8xf32>
    %151 = vector.shape_cast %150 : vector<8xf32> to vector<8x1xf32>
    %152 = vector.broadcast %151 : vector<8x1xf32> to vector<8x8xf32>
    %153 = arith.subf %149, %152 : vector<8x8xf32>
    %154 = math.exp %153 : vector<8x8xf32>
    %cst_57 = arith.constant dense<0.000000e+00> : vector<8xf32>
    %155 = vector.multi_reduction <add>, %154, %cst_57 [1] : vector<8x8xf32> to vector<8xf32>
    %156 = vector.shape_cast %155 : vector<8xf32> to vector<8x1xf32>
    %157 = tpu.reciprocal %156 {approx = true} : vector<8x1xf32> -> vector<8x1xf32>
    %158 = vector.broadcast %157 : vector<8x1xf32> to vector<8x8xf32>
    %159 = arith.mulf %154, %158 : vector<8x8xf32>
    %cst_58 = arith.constant dense<0.000000e+00> : vector<8x8xf32>
    %160 = tpu.matmul %159, %147, %cst_58 {dimension_numbers = #tpu.dot_dimension_numbers<[1], [0], [0], [1], [0, 0, 1, 1], [], []>} : vector<8x8xf32>, vector<8x8xf32>, vector<8x8xf32> -> vector<8x8xf32>
    %161 = vector.extract_strided_slice %142 {offsets = [0, 8], sizes = [8, 8], strides = [1, 1]} : vector<8x32xf32> to vector<8x8xf32>
    %162 = vector.extract_strided_slice %143 {offsets = [0, 8], sizes = [8, 8], strides = [1, 1]} : vector<8x32xf32> to vector<8x8xf32>
    %163 = vector.extract_strided_slice %144 {offsets = [0, 8], sizes = [8, 8], strides = [1, 1]} : vector<8x32xf32> to vector<8x8xf32>
    %cst_59 = arith.constant dense<0.000000e+00> : vector<8x8xf32>
    %164 = tpu.matmul %161, %162, %cst_59 {dimension_numbers = #tpu.dot_dimension_numbers<[1], [1], [0], [0], [0, 0, 1, 0], [], []>} : vector<8x8xf32>, vector<8x8xf32>, vector<8x8xf32> -> vector<8x8xf32>
    %165 = arith.addf %164, %11 : vector<8x8xf32>
    %cst_60 = arith.constant dense<0xFF800000> : vector<8xf32>
    %166 = vector.multi_reduction <maximumf>, %165, %cst_60 [1] : vector<8x8xf32> to vector<8xf32>
    %167 = vector.shape_cast %166 : vector<8xf32> to vector<8x1xf32>
    %168 = vector.broadcast %167 : vector<8x1xf32> to vector<8x8xf32>
    %169 = arith.subf %165, %168 : vector<8x8xf32>
    %170 = math.exp %169 : vector<8x8xf32>
    %cst_61 = arith.constant dense<0.000000e+00> : vector<8xf32>
    %171 = vector.multi_reduction <add>, %170, %cst_61 [1] : vector<8x8xf32> to vector<8xf32>
    %172 = vector.shape_cast %171 : vector<8xf32> to vector<8x1xf32>
    %173 = tpu.reciprocal %172 {approx = true} : vector<8x1xf32> -> vector<8x1xf32>
    %174 = vector.broadcast %173 : vector<8x1xf32> to vector<8x8xf32>
    %175 = arith.mulf %170, %174 : vector<8x8xf32>
    %cst_62 = arith.constant dense<0.000000e+00> : vector<8x8xf32>
    %176 = tpu.matmul %175, %163, %cst_62 {dimension_numbers = #tpu.dot_dimension_numbers<[1], [0], [0], [1], [0, 0, 1, 1], [], []>} : vector<8x8xf32>, vector<8x8xf32>, vector<8x8xf32> -> vector<8x8xf32>
    %177 = vector.extract_strided_slice %142 {offsets = [0, 16], sizes = [8, 8], strides = [1, 1]} : vector<8x32xf32> to vector<8x8xf32>
    %178 = vector.extract_strided_slice %143 {offsets = [0, 16], sizes = [8, 8], strides = [1, 1]} : vector<8x32xf32> to vector<8x8xf32>
    %179 = vector.extract_strided_slice %144 {offsets = [0, 16], sizes = [8, 8], strides = [1, 1]} : vector<8x32xf32> to vector<8x8xf32>
    %cst_63 = arith.constant dense<0.000000e+00> : vector<8x8xf32>
    %180 = tpu.matmul %177, %178, %cst_63 {dimension_numbers = #tpu.dot_dimension_numbers<[1], [1], [0], [0], [0, 0, 1, 0], [], []>} : vector<8x8xf32>, vector<8x8xf32>, vector<8x8xf32> -> vector<8x8xf32>
    %181 = arith.addf %180, %11 : vector<8x8xf32>
    %cst_64 = arith.constant dense<0xFF800000> : vector<8xf32>
    %182 = vector.multi_reduction <maximumf>, %181, %cst_64 [1] : vector<8x8xf32> to vector<8xf32>
    %183 = vector.shape_cast %182 : vector<8xf32> to vector<8x1xf32>
    %184 = vector.broadcast %183 : vector<8x1xf32> to vector<8x8xf32>
    %185 = arith.subf %181, %184 : vector<8x8xf32>
    %186 = math.exp %185 : vector<8x8xf32>
    %cst_65 = arith.constant dense<0.000000e+00> : vector<8xf32>
    %187 = vector.multi_reduction <add>, %186, %cst_65 [1] : vector<8x8xf32> to vector<8xf32>
    %188 = vector.shape_cast %187 : vector<8xf32> to vector<8x1xf32>
    %189 = tpu.reciprocal %188 {approx = true} : vector<8x1xf32> -> vector<8x1xf32>
    %190 = vector.broadcast %189 : vector<8x1xf32> to vector<8x8xf32>
    %191 = arith.mulf %186, %190 : vector<8x8xf32>
    %cst_66 = arith.constant dense<0.000000e+00> : vector<8x8xf32>
    %192 = tpu.matmul %191, %179, %cst_66 {dimension_numbers = #tpu.dot_dimension_numbers<[1], [0], [0], [1], [0, 0, 1, 1], [], []>} : vector<8x8xf32>, vector<8x8xf32>, vector<8x8xf32> -> vector<8x8xf32>
    %193 = vector.extract_strided_slice %142 {offsets = [0, 24], sizes = [8, 8], strides = [1, 1]} : vector<8x32xf32> to vector<8x8xf32>
    %194 = vector.extract_strided_slice %143 {offsets = [0, 24], sizes = [8, 8], strides = [1, 1]} : vector<8x32xf32> to vector<8x8xf32>
    %195 = vector.extract_strided_slice %144 {offsets = [0, 24], sizes = [8, 8], strides = [1, 1]} : vector<8x32xf32> to vector<8x8xf32>
    %cst_67 = arith.constant dense<0.000000e+00> : vector<8x8xf32>
    %196 = tpu.matmul %193, %194, %cst_67 {dimension_numbers = #tpu.dot_dimension_numbers<[1], [1], [0], [0], [0, 0, 1, 0], [], []>} : vector<8x8xf32>, vector<8x8xf32>, vector<8x8xf32> -> vector<8x8xf32>
    %197 = arith.addf %196, %11 : vector<8x8xf32>
    %cst_68 = arith.constant dense<0xFF800000> : vector<8xf32>
    %198 = vector.multi_reduction <maximumf>, %197, %cst_68 [1] : vector<8x8xf32> to vector<8xf32>
    %199 = vector.shape_cast %198 : vector<8xf32> to vector<8x1xf32>
    %200 = vector.broadcast %199 : vector<8x1xf32> to vector<8x8xf32>
    %201 = arith.subf %197, %200 : vector<8x8xf32>
    %202 = math.exp %201 : vector<8x8xf32>
    %cst_69 = arith.constant dense<0.000000e+00> : vector<8xf32>
    %203 = vector.multi_reduction <add>, %202, %cst_69 [1] : vector<8x8xf32> to vector<8xf32>
    %204 = vector.shape_cast %203 : vector<8xf32> to vector<8x1xf32>
    %205 = tpu.reciprocal %204 {approx = true} : vector<8x1xf32> -> vector<8x1xf32>
    %206 = vector.broadcast %205 : vector<8x1xf32> to vector<8x8xf32>
    %207 = arith.mulf %202, %206 : vector<8x8xf32>
    %cst_70 = arith.constant dense<0.000000e+00> : vector<8x8xf32>
    %208 = tpu.matmul %207, %195, %cst_70 {dimension_numbers = #tpu.dot_dimension_numbers<[1], [0], [0], [1], [0, 0, 1, 1], [], []>} : vector<8x8xf32>, vector<8x8xf32>, vector<8x8xf32> -> vector<8x8xf32>
    %209 = tpu.concatenate %160, %176, %192, %208 in 1 : vector<8x8xf32>, vector<8x8xf32>, vector<8x8xf32>, vector<8x8xf32> -> vector<8x32xf32>
    %c0_71 = arith.constant 0 : index
    %c0_72 = arith.constant 0 : index
    %210 = vector.load %arg9[%c0_71, %c0_72] : memref<32x32xf32, #tpu.memory_space<vmem>>, vector<32x32xf32>
    %cst_73 = arith.constant dense<0.000000e+00> : vector<8x32xf32>
    %211 = tpu.matmul %209, %210, %cst_73 {dimension_numbers = #tpu.dot_dimension_numbers<[1], [0], [0], [1], [0, 0, 1, 1], [], []>} : vector<8x32xf32>, vector<32x32xf32>, vector<8x32xf32> -> vector<8x32xf32>
    %212 = arith.addf %129, %211 : vector<8x32xf32>
    %213 = arith.mulf %212, %212 : vector<8x32xf32>
    %cst_74 = arith.constant dense<0.000000e+00> : vector<8xf32>
    %214 = vector.multi_reduction <add>, %213, %cst_74 [1] : vector<8x32xf32> to vector<8xf32>
    %215 = vector.shape_cast %214 : vector<8xf32> to vector<8x1xf32>
    %cst_75 = arith.constant 3.200000e+01 : f32
    %216 = vector.broadcast %cst_75 : f32 to vector<8x1xf32>
    %217 = arith.divf %215, %216 : vector<8x1xf32>
    %cst_76 = arith.constant 9.99999997E-7 : f32
    %218 = vector.broadcast %cst_76 : f32 to vector<8x1xf32>
    %219 = arith.addf %217, %218 : vector<8x1xf32>
    %220 = math.rsqrt %219 : vector<8x1xf32>
    %221 = vector.broadcast %220 : vector<8x1xf32> to vector<8x32xf32>
    %222 = arith.mulf %212, %221 : vector<8x32xf32>
    %c0_77 = arith.constant 0 : index
    %c0_78 = arith.constant 0 : index
    %223 = vector.load %arg10[%c0_77, %c0_78] : memref<32x32xf32, #tpu.memory_space<vmem>>, vector<32x32xf32>
    %cst_79 = arith.constant dense<0.000000e+00> : vector<8x32xf32>
    %224 = tpu.matmul %222, %223, %cst_79 {dimension_numbers = #tpu.dot_dimension_numbers<[1], [0], [0], [1], [0, 0, 1, 1], [], []>} : vector<8x32xf32>, vector<32x32xf32>, vector<8x32xf32> -> vector<8x32xf32>
    %c0_80 = arith.constant 0 : index
    %c0_81 = arith.constant 0 : index
    %225 = vector.load %arg11[%c0_80, %c0_81] : memref<32x64xf32, #tpu.memory_space<vmem>>, vector<32x64xf32>
    %cst_82 = arith.constant dense<0.000000e+00> : vector<8x64xf32>
    %226 = tpu.matmul %127, %225, %cst_82 {dimension_numbers = #tpu.dot_dimension_numbers<[1], [0], [0], [1], [0, 0, 1, 1], [], []>} : vector<8x32xf32>, vector<32x64xf32>, vector<8x64xf32> -> vector<8x64xf32>
    %227 = vector.extract_strided_slice %226 {offsets = [0, 0], sizes = [8, 32], strides = [1, 1]} : vector<8x64xf32> to vector<8x32xf32>
    %228 = vector.extract_strided_slice %226 {offsets = [0, 32], sizes = [8, 32], strides = [1, 1]} : vector<8x64xf32> to vector<8x32xf32>
    %229 = vector.extract_strided_slice %224 {offsets = [0, 0], sizes = [8, 8], strides = [1, 1]} : vector<8x32xf32> to vector<8x8xf32>
    %230 = vector.extract_strided_slice %227 {offsets = [0, 0], sizes = [8, 8], strides = [1, 1]} : vector<8x32xf32> to vector<8x8xf32>
    %231 = vector.extract_strided_slice %228 {offsets = [0, 0], sizes = [8, 8], strides = [1, 1]} : vector<8x32xf32> to vector<8x8xf32>
    %cst_83 = arith.constant dense<0.000000e+00> : vector<8x8xf32>
    %232 = tpu.matmul %229, %230, %cst_83 {dimension_numbers = #tpu.dot_dimension_numbers<[1], [1], [0], [0], [0, 0, 1, 0], [], []>} : vector<8x8xf32>, vector<8x8xf32>, vector<8x8xf32> -> vector<8x8xf32>
    %233 = vector.broadcast %5 : vector<1x8xf32> to vector<8x8xf32>
    %234 = arith.addf %232, %233 : vector<8x8xf32>
    %cst_84 = arith.constant dense<0xFF800000> : vector<8xf32>
    %235 = vector.multi_reduction <maximumf>, %234, %cst_84 [1] : vector<8x8xf32> to vector<8xf32>
    %236 = vector.shape_cast %235 : vector<8xf32> to vector<8x1xf32>
    %237 = vector.broadcast %236 : vector<8x1xf32> to vector<8x8xf32>
    %238 = arith.subf %234, %237 : vector<8x8xf32>
    %239 = math.exp %238 : vector<8x8xf32>
    %cst_85 = arith.constant dense<0.000000e+00> : vector<8xf32>
    %240 = vector.multi_reduction <add>, %239, %cst_85 [1] : vector<8x8xf32> to vector<8xf32>
    %241 = vector.shape_cast %240 : vector<8xf32> to vector<8x1xf32>
    %242 = tpu.reciprocal %241 {approx = true} : vector<8x1xf32> -> vector<8x1xf32>
    %243 = vector.broadcast %242 : vector<8x1xf32> to vector<8x8xf32>
    %244 = arith.mulf %239, %243 : vector<8x8xf32>
    %cst_86 = arith.constant dense<0.000000e+00> : vector<8x8xf32>
    %245 = tpu.matmul %244, %231, %cst_86 {dimension_numbers = #tpu.dot_dimension_numbers<[1], [0], [0], [1], [0, 0, 1, 1], [], []>} : vector<8x8xf32>, vector<8x8xf32>, vector<8x8xf32> -> vector<8x8xf32>
    %246 = vector.extract_strided_slice %224 {offsets = [0, 8], sizes = [8, 8], strides = [1, 1]} : vector<8x32xf32> to vector<8x8xf32>
    %247 = vector.extract_strided_slice %227 {offsets = [0, 8], sizes = [8, 8], strides = [1, 1]} : vector<8x32xf32> to vector<8x8xf32>
    %248 = vector.extract_strided_slice %228 {offsets = [0, 8], sizes = [8, 8], strides = [1, 1]} : vector<8x32xf32> to vector<8x8xf32>
    %cst_87 = arith.constant dense<0.000000e+00> : vector<8x8xf32>
    %249 = tpu.matmul %246, %247, %cst_87 {dimension_numbers = #tpu.dot_dimension_numbers<[1], [1], [0], [0], [0, 0, 1, 0], [], []>} : vector<8x8xf32>, vector<8x8xf32>, vector<8x8xf32> -> vector<8x8xf32>
    %250 = vector.broadcast %5 : vector<1x8xf32> to vector<8x8xf32>
    %251 = arith.addf %249, %250 : vector<8x8xf32>
    %cst_88 = arith.constant dense<0xFF800000> : vector<8xf32>
    %252 = vector.multi_reduction <maximumf>, %251, %cst_88 [1] : vector<8x8xf32> to vector<8xf32>
    %253 = vector.shape_cast %252 : vector<8xf32> to vector<8x1xf32>
    %254 = vector.broadcast %253 : vector<8x1xf32> to vector<8x8xf32>
    %255 = arith.subf %251, %254 : vector<8x8xf32>
    %256 = math.exp %255 : vector<8x8xf32>
    %cst_89 = arith.constant dense<0.000000e+00> : vector<8xf32>
    %257 = vector.multi_reduction <add>, %256, %cst_89 [1] : vector<8x8xf32> to vector<8xf32>
    %258 = vector.shape_cast %257 : vector<8xf32> to vector<8x1xf32>
    %259 = tpu.reciprocal %258 {approx = true} : vector<8x1xf32> -> vector<8x1xf32>
    %260 = vector.broadcast %259 : vector<8x1xf32> to vector<8x8xf32>
    %261 = arith.mulf %256, %260 : vector<8x8xf32>
    %cst_90 = arith.constant dense<0.000000e+00> : vector<8x8xf32>
    %262 = tpu.matmul %261, %248, %cst_90 {dimension_numbers = #tpu.dot_dimension_numbers<[1], [0], [0], [1], [0, 0, 1, 1], [], []>} : vector<8x8xf32>, vector<8x8xf32>, vector<8x8xf32> -> vector<8x8xf32>
    %263 = vector.extract_strided_slice %224 {offsets = [0, 16], sizes = [8, 8], strides = [1, 1]} : vector<8x32xf32> to vector<8x8xf32>
    %264 = vector.extract_strided_slice %227 {offsets = [0, 16], sizes = [8, 8], strides = [1, 1]} : vector<8x32xf32> to vector<8x8xf32>
    %265 = vector.extract_strided_slice %228 {offsets = [0, 16], sizes = [8, 8], strides = [1, 1]} : vector<8x32xf32> to vector<8x8xf32>
    %cst_91 = arith.constant dense<0.000000e+00> : vector<8x8xf32>
    %266 = tpu.matmul %263, %264, %cst_91 {dimension_numbers = #tpu.dot_dimension_numbers<[1], [1], [0], [0], [0, 0, 1, 0], [], []>} : vector<8x8xf32>, vector<8x8xf32>, vector<8x8xf32> -> vector<8x8xf32>
    %267 = vector.broadcast %5 : vector<1x8xf32> to vector<8x8xf32>
    %268 = arith.addf %266, %267 : vector<8x8xf32>
    %cst_92 = arith.constant dense<0xFF800000> : vector<8xf32>
    %269 = vector.multi_reduction <maximumf>, %268, %cst_92 [1] : vector<8x8xf32> to vector<8xf32>
    %270 = vector.shape_cast %269 : vector<8xf32> to vector<8x1xf32>
    %271 = vector.broadcast %270 : vector<8x1xf32> to vector<8x8xf32>
    %272 = arith.subf %268, %271 : vector<8x8xf32>
    %273 = math.exp %272 : vector<8x8xf32>
    %cst_93 = arith.constant dense<0.000000e+00> : vector<8xf32>
    %274 = vector.multi_reduction <add>, %273, %cst_93 [1] : vector<8x8xf32> to vector<8xf32>
    %275 = vector.shape_cast %274 : vector<8xf32> to vector<8x1xf32>
    %276 = tpu.reciprocal %275 {approx = true} : vector<8x1xf32> -> vector<8x1xf32>
    %277 = vector.broadcast %276 : vector<8x1xf32> to vector<8x8xf32>
    %278 = arith.mulf %273, %277 : vector<8x8xf32>
    %cst_94 = arith.constant dense<0.000000e+00> : vector<8x8xf32>
    %279 = tpu.matmul %278, %265, %cst_94 {dimension_numbers = #tpu.dot_dimension_numbers<[1], [0], [0], [1], [0, 0, 1, 1], [], []>} : vector<8x8xf32>, vector<8x8xf32>, vector<8x8xf32> -> vector<8x8xf32>
    %280 = vector.extract_strided_slice %224 {offsets = [0, 24], sizes = [8, 8], strides = [1, 1]} : vector<8x32xf32> to vector<8x8xf32>
    %281 = vector.extract_strided_slice %227 {offsets = [0, 24], sizes = [8, 8], strides = [1, 1]} : vector<8x32xf32> to vector<8x8xf32>
    %282 = vector.extract_strided_slice %228 {offsets = [0, 24], sizes = [8, 8], strides = [1, 1]} : vector<8x32xf32> to vector<8x8xf32>
    %cst_95 = arith.constant dense<0.000000e+00> : vector<8x8xf32>
    %283 = tpu.matmul %280, %281, %cst_95 {dimension_numbers = #tpu.dot_dimension_numbers<[1], [1], [0], [0], [0, 0, 1, 0], [], []>} : vector<8x8xf32>, vector<8x8xf32>, vector<8x8xf32> -> vector<8x8xf32>
    %284 = vector.broadcast %5 : vector<1x8xf32> to vector<8x8xf32>
    %285 = arith.addf %283, %284 : vector<8x8xf32>
    %cst_96 = arith.constant dense<0xFF800000> : vector<8xf32>
    %286 = vector.multi_reduction <maximumf>, %285, %cst_96 [1] : vector<8x8xf32> to vector<8xf32>
    %287 = vector.shape_cast %286 : vector<8xf32> to vector<8x1xf32>
    %288 = vector.broadcast %287 : vector<8x1xf32> to vector<8x8xf32>
    %289 = arith.subf %285, %288 : vector<8x8xf32>
    %290 = math.exp %289 : vector<8x8xf32>
    %cst_97 = arith.constant dense<0.000000e+00> : vector<8xf32>
    %291 = vector.multi_reduction <add>, %290, %cst_97 [1] : vector<8x8xf32> to vector<8xf32>
    %292 = vector.shape_cast %291 : vector<8xf32> to vector<8x1xf32>
    %293 = tpu.reciprocal %292 {approx = true} : vector<8x1xf32> -> vector<8x1xf32>
    %294 = vector.broadcast %293 : vector<8x1xf32> to vector<8x8xf32>
    %295 = arith.mulf %290, %294 : vector<8x8xf32>
    %cst_98 = arith.constant dense<0.000000e+00> : vector<8x8xf32>
    %296 = tpu.matmul %295, %282, %cst_98 {dimension_numbers = #tpu.dot_dimension_numbers<[1], [0], [0], [1], [0, 0, 1, 1], [], []>} : vector<8x8xf32>, vector<8x8xf32>, vector<8x8xf32> -> vector<8x8xf32>
    %297 = tpu.concatenate %245, %262, %279, %296 in 1 : vector<8x8xf32>, vector<8x8xf32>, vector<8x8xf32>, vector<8x8xf32> -> vector<8x32xf32>
    %c0_99 = arith.constant 0 : index
    %c0_100 = arith.constant 0 : index
    %298 = vector.load %arg12[%c0_99, %c0_100] : memref<32x32xf32, #tpu.memory_space<vmem>>, vector<32x32xf32>
    %cst_101 = arith.constant dense<0.000000e+00> : vector<8x32xf32>
    %299 = tpu.matmul %297, %298, %cst_101 {dimension_numbers = #tpu.dot_dimension_numbers<[1], [0], [0], [1], [0, 0, 1, 1], [], []>} : vector<8x32xf32>, vector<32x32xf32>, vector<8x32xf32> -> vector<8x32xf32>
    %300 = arith.addf %212, %299 : vector<8x32xf32>
    %301 = arith.mulf %300, %300 : vector<8x32xf32>
    %cst_102 = arith.constant dense<0.000000e+00> : vector<8xf32>
    %302 = vector.multi_reduction <add>, %301, %cst_102 [1] : vector<8x32xf32> to vector<8xf32>
    %303 = vector.shape_cast %302 : vector<8xf32> to vector<8x1xf32>
    %cst_103 = arith.constant 3.200000e+01 : f32
    %304 = vector.broadcast %cst_103 : f32 to vector<8x1xf32>
    %305 = arith.divf %303, %304 : vector<8x1xf32>
    %cst_104 = arith.constant 9.99999997E-7 : f32
    %306 = vector.broadcast %cst_104 : f32 to vector<8x1xf32>
    %307 = arith.addf %305, %306 : vector<8x1xf32>
    %308 = math.rsqrt %307 : vector<8x1xf32>
    %309 = vector.broadcast %308 : vector<8x1xf32> to vector<8x32xf32>
    %310 = arith.mulf %300, %309 : vector<8x32xf32>
    %c0_105 = arith.constant 0 : index
    %c0_106 = arith.constant 0 : index
    %311 = vector.load %arg13[%c0_105, %c0_106] : memref<32x64xf32, #tpu.memory_space<vmem>>, vector<32x64xf32>
    %cst_107 = arith.constant dense<0.000000e+00> : vector<8x64xf32>
    %312 = tpu.matmul %310, %311, %cst_107 {dimension_numbers = #tpu.dot_dimension_numbers<[1], [0], [0], [1], [0, 0, 1, 1], [], []>} : vector<8x32xf32>, vector<32x64xf32>, vector<8x64xf32> -> vector<8x64xf32>
    %cst_108 = arith.constant 0.000000e+00 : f32
    %313 = vector.broadcast %cst_108 : f32 to vector<8x64xf32>
    %314 = arith.maximumf %312, %313 : vector<8x64xf32>
    %c0_109 = arith.constant 0 : index
    %c0_110 = arith.constant 0 : index
    %315 = vector.load %arg14[%c0_109, %c0_110] : memref<64x32xf32, #tpu.memory_space<vmem>>, vector<64x32xf32>
    %cst_111 = arith.constant dense<0.000000e+00> : vector<8x32xf32>
    %316 = tpu.matmul %314, %315, %cst_111 {dimension_numbers = #tpu.dot_dimension_numbers<[1], [0], [0], [1], [0, 0, 1, 1], [], []>} : vector<8x64xf32>, vector<64x32xf32>, vector<8x32xf32> -> vector<8x32xf32>
    %317 = arith.addf %300, %316 : vector<8x32xf32>
    %318 = arith.mulf %317, %317 : vector<8x32xf32>
    %cst_112 = arith.constant dense<0.000000e+00> : vector<8xf32>
    %319 = vector.multi_reduction <add>, %318, %cst_112 [1] : vector<8x32xf32> to vector<8xf32>
    %320 = vector.shape_cast %319 : vector<8xf32> to vector<8x1xf32>
    %cst_113 = arith.constant 3.200000e+01 : f32
    %321 = vector.broadcast %cst_113 : f32 to vector<8x1xf32>
    %322 = arith.divf %320, %321 : vector<8x1xf32>
    %cst_114 = arith.constant 9.99999997E-7 : f32
    %323 = vector.broadcast %cst_114 : f32 to vector<8x1xf32>
    %324 = arith.addf %322, %323 : vector<8x1xf32>
    %325 = math.rsqrt %324 : vector<8x1xf32>
    %326 = vector.broadcast %325 : vector<8x1xf32> to vector<8x32xf32>
    %327 = arith.mulf %317, %326 : vector<8x32xf32>
    %c0_115 = arith.constant 0 : index
    %c0_116 = arith.constant 0 : index
    %328 = vector.load %arg15[%c0_115, %c0_116] : memref<32x32xf32, #tpu.memory_space<vmem>>, vector<32x32xf32>
    %cst_117 = arith.constant dense<0.000000e+00> : vector<8x32xf32>
    %329 = tpu.matmul %327, %328, %cst_117 {dimension_numbers = #tpu.dot_dimension_numbers<[1], [0], [0], [1], [0, 0, 1, 1], [], []>} : vector<8x32xf32>, vector<32x32xf32>, vector<8x32xf32> -> vector<8x32xf32>
    %c0_118 = arith.constant 0 : index
    %c0_119 = arith.constant 0 : index
    %c0_120 = arith.constant 0 : index
    %330 = vector.load %arg16[%c0_118, %c0_119, %c0_120] : memref<1x8x32xf32, #tpu.memory_space<vmem>>, vector<1x8x32xf32>
    %331 = vector.shape_cast %330 : vector<1x8x32xf32> to vector<8x32xf32>
    %332 = vector.shape_cast %329 : vector<8x32xf32> to vector<1x8x32xf32>
    tpu.vector_store %arg16[%c0_118, %c0_119, %c0_120], %332 {strides = array<i32>} : memref<1x8x32xf32, #tpu.memory_space<vmem>>, vector<1x8x32xf32>,
    return
  }
  func.func @transform_0(%arg0: i32) -> (i32, i32, i32) {
    %c0_i32 = arith.constant 0 : i32
    %c0_i32_0 = arith.constant 0 : i32
    %c0_i32_1 = arith.constant 0 : i32
    return %arg0, %c0_i32, %c0_i32_0 : i32, i32, i32
  }
  func.func @transform_1(%arg0: i32) -> (i32, i32, i32) {
    %c0_i32 = arith.constant 0 : i32
    %c0_i32_0 = arith.constant 0 : i32
    %c0_i32_1 = arith.constant 0 : i32
    return %arg0, %c0_i32, %c0_i32_0 : i32, i32, i32
  }
  func.func @transform_2(%arg0: i32) -> (i32, i32, i32) {
    %c0_i32 = arith.constant 0 : i32
    %c0_i32_0 = arith.constant 0 : i32
    %c0_i32_1 = arith.constant 0 : i32
    return %arg0, %c0_i32, %c0_i32_0 : i32, i32, i32
  }
  func.func @transform_3(%arg0: i32) -> (i32, i32) {
    %c0_i32 = arith.constant 0 : i32
    %c0_i32_0 = arith.constant 0 : i32
    %c0_i32_1 = arith.constant 0 : i32
    return %c0_i32, %c0_i32_0 : i32, i32
  }
  func.func @transform_4(%arg0: i32) -> (i32, i32) {
    %c0_i32 = arith.constant 0 : i32
    %c0_i32_0 = arith.constant 0 : i32
    %c0_i32_1 = arith.constant 0 : i32
    return %c0_i32, %c0_i32_0 : i32, i32
  }
  func.func @transform_5(%arg0: i32) -> (i32, i32) {
    %c0_i32 = arith.constant 0 : i32
    %c0_i32_0 = arith.constant 0 : i32
    %c0_i32_1 = arith.constant 0 : i32
    return %c0_i32, %c0_i32_0 : i32, i32
  }
  func.func @transform_6(%arg0: i32) -> (i32, i32) {
    %c0_i32 = arith.constant 0 : i32
    %c0_i32_0 = arith.constant 0 : i32
    %c0_i32_1 = arith.constant 0 : i32
    return %c0_i32, %c0_i32_0 : i32, i32
  }
  func.func @transform_7(%arg0: i32) -> (i32, i32) {
    %c0_i32 = arith.constant 0 : i32
    %c0_i32_0 = arith.constant 0 : i32
    %c0_i32_1 = arith.constant 0 : i32
    return %c0_i32, %c0_i32_0 : i32, i32
  }
  func.func @transform_8(%arg0: i32) -> (i32, i32) {
    %c0_i32 = arith.constant 0 : i32
    %c0_i32_0 = arith.constant 0 : i32
    %c0_i32_1 = arith.constant 0 : i32
    return %c0_i32, %c0_i32_0 : i32, i32
  }
  func.func @transform_9(%arg0: i32) -> (i32, i32) {
    %c0_i32 = arith.constant 0 : i32
    %c0_i32_0 = arith.constant 0 : i32
    %c0_i32_1 = arith.constant 0 : i32
    return %c0_i32, %c0_i32_0 : i32, i32
  }
  func.func @transform_10(%arg0: i32) -> (i32, i32) {
    %c0_i32 = arith.constant 0 : i32
    %c0_i32_0 = arith.constant 0 : i32
    %c0_i32_1 = arith.constant 0 : i32
    return %c0_i32, %c0_i32_0 : i32, i32
  }
  func.func @transform_11(%arg0: i32) -> (i32, i32) {
    %c0_i32 = arith.constant 0 : i32
    %c0_i32_0 = arith.constant 0 : i32
    %c0_i32_1 = arith.constant 0 : i32
    return %c0_i32, %c0_i32_0 : i32, i32
  }
  func.func @transform_12(%arg0: i32) -> (i32, i32) {
    %c0_i32 = arith.constant 0 : i32
    %c0_i32_0 = arith.constant 0 : i32
    %c0_i32_1 = arith.constant 0 : i32
    return %c0_i32, %c0_i32_0 : i32, i32
  }
  func.func @transform_13(%arg0: i32) -> (i32, i32) {
    %c0_i32 = arith.constant 0 : i32
    %c0_i32_0 = arith.constant 0 : i32
    %c0_i32_1 = arith.constant 0 : i32
    return %c0_i32, %c0_i32_0 : i32, i32
  }
  func.func @transform_14(%arg0: i32) -> (i32, i32) {
    %c0_i32 = arith.constant 0 : i32
    %c0_i32_0 = arith.constant 0 : i32
    %c0_i32_1 = arith.constant 0 : i32
    return %c0_i32, %c0_i32_0 : i32, i32
  }
  func.func @transform_15(%arg0: i32) -> (i32, i32, i32) {
    %c0_i32 = arith.constant 0 : i32
    %c0_i32_0 = arith.constant 0 : i32
    %c0_i32_1 = arith.constant 0 : i32
    return %arg0, %c0_i32, %c0_i32_0 : i32, i32, i32
  }
}

</mosaic_0001>

<bundles_post_ra>
// kernel: t5_forward.1
= control target key start
LH: loop header
LB: loop body
LE: loop exit
PB: predicated region body
PF: predicated region fallthrough
CT: control target
= control target key end

     0   :  { %s5023_s0 = inlined_call_operand.vmem [shape: f32[2,8,32], index: 0, kind: input, shape index: {}]   ;;  %s5024_s1 = inlined_call_operand.vmem [shape: f32[2,8,32], index: 1, kind: input, shape index: {}]   ;;  %s5025_s2 = inlined_call_operand.vmem [shape: f32[2,1,8], index: 2, kind: input, shape index: {}]   ;;  %s5026_s3 = inlined_call_operand.vmem [shape: f32[32,96], index: 3, kind: input, shape index: {}]   ;;  %s5027_s4 = inlined_call_operand.vmem [shape: f32[32,32], index: 4, kind: input, shape index: {}]   ;;  %s5028_s5 = inlined_call_operand.vmem [shape: f32[32,64], index: 5, kind: input, shape index: {}]   ;;  %s5029_s6 = inlined_call_operand.vmem [shape: f32[64,32], index: 6, kind: input, shape index: {}]   ;;  %s5030_s7 = inlined_call_operand.vmem [shape: f32[32,96], index: 7, kind: input, shape index: {}]   ;;  %s5031_s8 = inlined_call_operand.vmem [shape: f32[32,32], index: 8, kind: input, shape index: {}]   ;;  %s5032_s9 = inlined_call_operand.vmem [shape: f32[32,32], index: 9, kind: input, shape index: {}]   ;;  %s5033_s10 = inlined_call_operand.vmem [shape: f32[32,64], index: 10, kind: input, shape index: {}]   ;;  %s5034_s11 = inlined_call_operand.vmem [shape: f32[32,32], index: 11, kind: input, shape index: {}]   ;;  %s5035_s12 = inlined_call_operand.vmem [shape: f32[32,64], index: 12, kind: input, shape index: {}]   ;;  %s5036_s13 = inlined_call_operand.vmem [shape: f32[64,32], index: 13, kind: input, shape index: {}]   ;;  %s5037_s14 = inlined_call_operand.vmem [shape: f32[32,32], index: 14, kind: input, shape index: {}]   ;;  %s5038_s15 = inlined_call_operand.hbm [shape: f32[2,8,32], index: 15, kind: output, shape index: {}]  }
   0x1   :  { %5066 = sst [smem:[#allocation8_spill]] %s5023_s0 }
   0x2   :  { %5067 = sst [smem:[#allocation9_spill]] %s5024_s1 }
   0x3   :  { %5068 = sst [smem:[#allocation10_spill]] %s5025_s2 }
   0x4   :  { %5069 = sst [smem:[#allocation11_spill]] %s5026_s3 }
   0x5   :  { %5070 = sst [smem:[#allocation12_spill]] %s5027_s4 }
   0x6   :  { %5071 = sst [smem:[#allocation13_spill]] %s5028_s5 }
   0x7   :  { %5072 = sst [smem:[#allocation14_spill]] %s5029_s6 }
   0x8   :  { %5073 = sst [smem:[#allocation15_spill]] %s5030_s7 }
   0x9   :  { %5074 = sst [smem:[#allocation16_spill]] %s5031_s8 }
   0xa   :  { %20 = vsyncpa [#allocation3], 0 }
   0xb   :  { %22 = vsyncpa [#allocation3 + $0x1], 0  ;;  %s4376_s18 = smov 0   ;;  %s4378_s19 = smov 0  }
   0xc   :  { %s4380_s20 = smov 0   ;;  %s4382_s21 = smov 0  }
   0xd LB: > { %5075 = sst [smem:[#allocation5_spill]] %s4272_s20  ;;  %s4397_s22 = sadd.s32 4294967295, %s4276_s21   ;;  %s4276_s21 = sphi %s4382_s21, %s5103_s21   ;;  %s4272_s20 = sphi %s4380_s20, %s5108_s20   ;;  %s4268_s19 = sphi %s4378_s19, %s5107_s19   ;;  %s4264_s18 = sphi %s4376_s18, %s5106_s18  }
   0xe   : > { %s3655_s23 = sadd.s32 4294967294, %s4276_s21   ;;  %s4401_s24 = sadd.s32 1, %s4276_s21  }
   0xf   : > { %5076 = sst [smem:[#allocation6_spill]] %s4401_s24  ;;  %s365_s25 = sadd.s32 1, %s4272_s20 }
  0x10   : > { %s362_s26 = ssub.s32 %s4276_s21, %s4401_s24  ;;  %p375_p0 = scmp.ne.s32.totalorder %s4272_s20, %s4268_s19 }
  0x11   : > { %p363_p1 = scmp.eq.s32.totalorder %s362_s26, 0  ;;  %p376_p2 = scmp.eq.s32.totalorder %s4397_s22, 1 }
  0x12   : > { %p381_p3 = scmp.ne.s32.totalorder %s4268_s19, %s4264_s18  ;;  %p382_p4 = scmp.eq.s32.totalorder %s3655_s23, 1 }
  0x13   : > { %s4412_s27 = scalar_select %p363_p1, %s4272_s20, %s365_s25  }
  0x14   : > { %p4414_p5 = por %p376_p2, %p375_p0  ;;  %p4418_p6 = por %p382_p4, %p381_p3 }
  0x15   : > { %5077 = sst [smem:[#allocation7_spill]] %s4412_s27  ;;  %p3658_p7 = scmp.ge.s32.totalorder %s4276_s21, 1 }
  0x16   : > { %p456_p8 = scmp.lt.s32.totalorder %s4276_s21, 3 }
  0x18   : > { %p457_p9 = pnand %p3658_p7, %p456_p8 }
  0x19   : > { %p510_p10 = scmp.lt.s32.totalorder (!%p457_p9), %s4397_s22, 1  ;;  %s5080_s0 = sld [smem:[#allocation8_spill]] (!%p457_p9) }
  0x1a   : > { %460 = sbr.rel (%p457_p9) target bundleno = 5997 (0x176d), region = 80  ;;  %s5081_s3 = sld [smem:[#allocation11_spill]] (!%p457_p9) }
  0x1b   : > { %s5056_s27 = smov (!%p457_p9), 96   ;;  %s5047_s26 = smov (!%p457_p9), 112  }
  0x1c   : > { %s5043_s17 = smov (!%p457_p9), 104   ;;  %s5082_s2 = sld [smem:[#allocation10_spill]] (!%p457_p9) }
  0x1d   : > { %s5042_s23 = smov (!%p457_p9), 64   ;;  %s5058_s20 = smov (!%p457_p9), 88  }
  0x1e   : > { %s5083_s4 = sld [smem:[#allocation12_spill]] (!%p457_p9) }
  0x1f   : > { %s4426_s30 = scalar_select %p510_p10, %s4397_s22, 1  ;;  %vm532_vm0 = vcmask 261120   ;;  %v4278_v4 = vmov 0.0   ;;  %vm4279_vm1 = vmmov 0   ;;  %vm627_vm2 = vcmask 64512  }
  0x20   : > { %v544_v3 = vld [vmem:[%s5081_s3 + $0x18] sm:$0xff]  ;;  %3830 = vmatprep.subr.mxu0 %v4278_v4  ;;  %v543_v5 = vld [vmem:[%s5081_s3 + $0x10] sm:$0xff]  ;;  %3838 = vmatprep.mubr.msk.f32.mxu0 %vm4279_vm1, %v4278_v4  ;;  %v542_v6 = vld [vmem:[%s5081_s3 + $0x8] sm:$0xff]  ;;  %v524_v16 = vlaneseq  ;;  %vm1297_vm3 = vcmask 130048   ;;  %vm1299_vm4 = vcmask 195584   ;;  %s5084_s1 = sld [smem:[#allocation9_spill]] }
  0x21   : > { %s3660_s16 = sshll.u32 %s4426_s30, 3  ;;  %3831 = vmatpush3.msra.mxu0 %v544_v3  ;;  %3841 = vmatprep.subr.mxu1 %v4278_v4  ;;  %v541_v7 = vld [vmem:[%s5081_s3] sm:$0xff]  ;;  %s5085_s5 = sld [smem:[#allocation13_spill]]  ;;  %vm1473_vm5 = vcmask 523264  }
  0x22   : > { %s513_s25 = scalar_lea.vmem %s5080_s0, %s3660_s16  ;;  %3832 = vmatprep.subr.mxu0 %v4278_v4  ;;  %3843 = vmatprep.mubr.msk.f32.mxu1 %vm4279_vm1, %v4278_v4  ;;  %s520_s24 = scalar_lea.vmem %s5082_s2, %s4426_s30  ;;  %v4486_v19 = vshrl.u32 %v524_v16, 7 }
  0x23   : > { %v4434_v0 = vld [vmem:[%s513_s25] sm:$0xff]  ;;  %3833 = vmatpush3.msra.mxu0 %v543_v5  ;;  %s5054_s25 = smov 120   ;;  %s5086_s6 = sld [smem:[#allocation14_spill]] }
  0x24   : > { %v531_v1 = vmul.f32 %v4434_v0, %v4434_v0  ;;  %3834 = vmatprep.subr.mxu0 %v4278_v4  ;;  %v521_v17 = vld [vmem:[%s520_s24] sm:$0x1]  ;;  %v621_v21 = vsub.s32 0, %v4486_v19  ;;  %s5052_s24 = smov 80   ;;  %s5087_s7 = sld [smem:[#allocation15_spill]] }
  0x25   : > { %3835 = vmatpush3.msra.mxu0 %v542_v6  ;;  %v522_v18 = vsub.f32 1.0, %v521_v17  ;;  %s5088_s30 = smov 88   ;;  %s5097_s0 = smov 64  }
  0x26   : > { %v533_v2 = vsel %vm532_vm0, %v531_v1, 0.0  ;;  %3836 = vmatprep.subr.mxu0 %v4278_v4  ;;  %s5099_s8 = sld [smem:[#allocation16_spill]] }
  0x27   : > { %534 = vadd.xlane.f32.xlu0 %v533_v2  ;;  %3837 = vmatpush3.msra.mxu0 %v541_v7  ;;  %v523_v20 = vmul.f32 -1e+09, %v522_v18 }
  0x28   : > { %3861 = vmatprep.subr.mxu0 %v4278_v4 }
  0x29   : > { %v4489_v22 = vrot.slane %v523_v20, %v621_v21 }
  0xb0   : > { %v535_v8 = vpop.xlane.xlu0 %534 }
  0xb1   : > { %v537_v9 = vmul.f32 0.03125, %v535_v8 }
  0xb3   : > { %v538_v10 = vadd.f32 1e-06, %v537_v9 }
  0xb5   : > { %4154 = vrsqrt.f32 %v538_v10 }
  0xc2   : > { %v4155_v11 = vpop.eup %4154 }
  0xc3   : > { %v540_v12 = vmul.f32 %v4155_v11, %v4434_v0 }
  0xc5   : > { %3839 = vmatmul.mubr.msk.f32.vlgmr.msra.gmra.mxu0 %vm532_vm0, %v540_v12 }
  0xc6   : > { %3863 = vmatprep.mubr.msk.f32.mxu0 %vm4279_vm1, %v4278_v4 }
 0x185   : > { %v4465_v13 = vpop.f32.mrf.mxu0 }
 0x186   : > { %625 = vrot.lane.b32.xlu0 %v4465_v13, %s5056_s27  ;;  %s5062_s27 = smov 16  }
 0x187   : > { %v3840_v14 = vpop.f32.mrf.mxu0 }
 0x18a   : > { %789 = vrot.lane.b32.xlu0 %v4465_v13, %s5054_s25  ;;  %s5060_s25 = smov 24  }
 0x18e   : > { %954 = vrot.lane.b32.xlu0 %v4465_v13, %s5047_s26  ;;  %s5050_s26 = smov 48  }
 0x192   : > { %1119 = vrot.lane.b32.xlu0 %v4465_v13, %s5043_s17  ;;  %s5051_s17 = smov 56  }
 0x1f8   : > { %v626_v15 = vpop.permute.xlu0 %625 }
 0x1f9   : > { %3842 = vmatpush3.xpose.msk.msra.mxu1 %vm627_vm2, %v626_v15 }
 0x1fa   : > { %3846 = vmatprep.subr.mxu1 %v4278_v4 }
 0x1fc   : > { %3844 = vmatmul.mubr.msk.f32.vlgmr.msra.gmra.mxu1 %vm627_vm2, %v4465_v13  ;;  %v790_v34 = vpop.permute.xlu0 %789 }
 0x1fd   : > { %3848 = vmatprep.mubr.msk.f32.mxu1 %vm4279_vm1, %v4278_v4 }
 0x200   : > { %v955_v37 = vpop.permute.xlu0 %954 }
 0x204   : > { %v1120_v39 = vpop.permute.xlu0 %1119 }
 0x2bc   : > { %v698_v23 = vpop.f32.mrf.mxu1 }
 0x2bd   : > { %v699_v24 = vadd.f32 %v698_v23, %v4489_v22 }
 0x2be   : > { %v3845_v25 = vpop.f32.mrf.mxu1 }
 0x2bf   : > { %v702_v26 = vsel %vm627_vm2, %v699_v24, -inf  ;;  %v1303_v25 = vld [vmem:[%s5083_s4 + $0x10] sm:$0xff] }
 0x2c0   : > { %703 = vmax.xlane.f32.xlu1 %v702_v26  ;;  %v1302_v26 = vld [vmem:[%s5083_s4 + $0x8] sm:$0xff] }
 0x2d1   : > { %713 = vrot.lane.b32.xlu1 %v4465_v13, %s5042_s23  ;;  %s5045_s23 = smov 72  }
 0x2d5   : > { %791 = vrot.lane.b32.xlu1 %v4465_v13, %s5058_s20  ;;  %s5092_s20 = smov 112  }
 0x349   : > { %v704_v27 = vpop.xlane.xlu1 %703 }
 0x34a   : > { %v705_v28 = vsub.f32 %v699_v24, %v704_v27  ;;  %v1304_v24 = vld [vmem:[%s5083_s4 + $0x18] sm:$0xff]  ;;  %v1301_v27 = vld [vmem:[%s5083_s4] sm:$0xff] }
 0x34c   : > { %v706_v29 = vmul.f32 1.442695, %v705_v28 }
 0x34d   : > { %v714_v30 = vpop.permute.xlu1 %713 }
 0x34e   : > { %4156 = vpow2.f32 %v706_v29  ;;  %3847 = vmatpush3.msra.mxu1 %v714_v30 }
 0x34f   : > { %3851 = vmatprep.subr.mxu1 %v4278_v4 }
 0x351   : > { %v792_v33 = vpop.permute.xlu1 %791 }
 0x35b   : > { %v4157_v31 = vpop.eup %4156 }
 0x35c   : > { %v708_v32 = vsel %vm627_vm2, %v4157_v31, 0.0 }
 0x35d   : > { %709 = vadd.xlane.f32.xlu1 %v708_v32 }
 0x36e   : > { %956 = vrot.lane.b32.xlu1 %v4465_v13, %s5052_s24  ;;  %s517_s24 = scalar_lea.vmem %s5084_s1, %s3660_s16  ;;  %s5089_s16 = smov 96  }
 0x36f   : > { %s5098_s1 = smov 40  }
 0x372   : > { %1121 = vrot.lane.b32.xlu1 %v4465_v13, %s5045_s23  ;;  %s5049_s23 = smov 40  }
 0x3e6   : > { %v710_v35 = vpop.xlane.xlu1 %709 }
 0x3e7   : > { %4158 = vrcp.f32 %v710_v35 }
 0x3ea   : > { %v957_v36 = vpop.permute.xlu1 %956 }
 0x3eb   : > { %3862 = vmatpush3.xpose.msk.msra.mxu0 %vm627_vm2, %v957_v36 }
 0x3ec   : > { %3871 = vmatprep.subr.mxu0 %v4278_v4 }
 0x3ee   : > { %v1122_v38 = vpop.permute.xlu1 %1121  ;;  %3864 = vmatmul.mubr.msk.f32.vlgmr.msra.gmra.mxu0 %vm627_vm2, %v955_v37 }
 0x3ef   : > { %3872 = vmatpush3.xpose.msk.msra.mxu0 %vm627_vm2, %v1122_v38  ;;  %3873 = vmatprep.mubr.msk.f32.mxu0 %vm4279_vm1, %v4278_v4 }
 0x3f0   : > { %3881 = vmatprep.subr.mxu0 %v4278_v4 }
 0x3f2   : > { %3874 = vmatmul.mubr.msk.f32.vlgmr.msra.gmra.mxu0 %vm627_vm2, %v1120_v39 }
 0x3f3   : > { %3889 = vmatprep.mubr.msk.f32.mxu0 %vm4279_vm1, %v4278_v4  ;;  %3882 = vmatpush3.msra.mxu0 %v1304_v24 }
 0x3f4   : > { %v4159_v40 = vpop.eup %4158  ;;  %3883 = vmatprep.subr.mxu0 %v4278_v4 }
 0x3f5   : > { %v712_v41 = vmul.f32 %v4159_v40, %v4157_v31  ;;  %3884 = vmatpush3.msra.mxu0 %v1303_v25  ;;  %v4581_v40 = vld [vmem:[%s517_s24] sm:$0xff]  ;;  %s5095_s24 = smov 56  }
 0x3f6   : > { %3885 = vmatprep.subr.mxu0 %v4278_v4 }
 0x3f7   : > { %3849 = vmatmul.mubr.msk.f32.vlgmr.msra.gmra.mxu1 %vm627_vm2, %v712_v41  ;;  %3886 = vmatpush3.msra.mxu0 %v1302_v26  ;;  %v1557_v41 = vmul.f32 %v4581_v40, %v4581_v40 }
 0x3f8   : > { %3852 = vmatpush3.xpose.msk.msra.mxu1 %vm627_vm2, %v792_v33  ;;  %3853 = vmatprep.mubr.msk.f32.mxu1 %vm4279_vm1, %v4278_v4 }
 0x3f9   : > { %3856 = vmatprep.subr.mxu1 %v4278_v4  ;;  %3887 = vmatprep.subr.mxu0 %v4278_v4 }
 0x3fa   : > { %3888 = vmatpush3.msra.mxu0 %v1301_v27 }
 0x3fb   : > { %3854 = vmatmul.mubr.msk.f32.vlgmr.msra.gmra.mxu1 %vm627_vm2, %v790_v34  ;;  %3903 = vmatprep.subr.mxu0 %v4278_v4 }
 0x3fc   : > { %3858 = vmatprep.mubr.msk.f32.mxu1 %vm4279_vm1, %v4278_v4 }
 0x4ae   : > { %v1028_v42 = vpop.f32.mrf.mxu0 }
 0x4af   : > { %v1029_v43 = vadd.f32 %v1028_v42, %v4489_v22  ;;  %v1558_v42 = vsel %vm532_vm0, %v1557_v41, 0.0 }
 0x4b0   : > { %v3865_v44 = vpop.f32.mrf.mxu0 }
 0x4b1   : > { %v1032_v45 = vsel %vm627_vm2, %v1029_v43, -inf }
 0x4b2   : > { %1033 = vmax.xlane.f32.xlu0 %v1032_v45  ;;  %v1193_v46 = vpop.f32.mrf.mxu0 }
 0x4b3   : > { %v1194_v47 = vadd.f32 %v1193_v46, %v4489_v22 }
 0x4b4   : > { %v3875_v48 = vpop.f32.mrf.mxu0 }
 0x4b5   : > { %v1197_v49 = vsel %vm627_vm2, %v1194_v47, -inf  ;;  %v1390_v48 = vld [vmem:[%s5085_s5 + $0x18] sm:$0xff] }
 0x4b6   : > { %1198 = vmax.xlane.f32.xlu0 %v1197_v49  ;;  %v1389_v49 = vld [vmem:[%s5085_s5 + $0x10] sm:$0xff] }
 0x4b7   : > { %v4525_v50 = vpop.f32.mrf.mxu1 }
 0x4b9   : > { %v3850_v51 = vpop.f32.mrf.mxu1 }
 0x4ba   : > { %v1472_v51 = vld [vmem:[%s5086_s6 + $0x38] sm:$0xff] }
 0x4bb   : > { %v863_v52 = vpop.f32.mrf.mxu1 }
 0x4bc   : > { %v864_v53 = vadd.f32 %v863_v52, %v4489_v22  ;;  %v1471_v52 = vld [vmem:[%s5086_s6 + $0x30] sm:$0xff] }
 0x4bd   : > { %v3855_v54 = vpop.f32.mrf.mxu1 }
 0x4be   : > { %v867_v55 = vsel %vm627_vm2, %v864_v53, -inf  ;;  %v1469_v54 = vld [vmem:[%s5086_s6 + $0x20] sm:$0xff] }
 0x4bf   : > { %868 = vmax.xlane.f32.xlu1 %v867_v55  ;;  %v1468_v55 = vld [vmem:[%s5086_s6 + $0x18] sm:$0xff] }
 0x53b   : > { %v1034_v56 = vpop.xlane.xlu0 %1033 }
 0x53c   : > { %v1035_v57 = vsub.f32 %v1029_v43, %v1034_v56  ;;  %v1467_v56 = vld [vmem:[%s5086_s6 + $0x10] sm:$0xff] }
 0x53e   : > { %v1036_v58 = vmul.f32 1.442695, %v1035_v57 }
 0x53f   : > { %v1199_v59 = vpop.xlane.xlu0 %1198 }
 0x540   : > { %4160 = vpow2.f32 %v1036_v58  ;;  %v1200_v60 = vsub.f32 %v1194_v47, %v1199_v59 }
 0x542   : > { %v1201_v61 = vmul.f32 1.442695, %v1200_v60 }
 0x544   : > { %4162 = vpow2.f32 %v1201_v61 }
 0x548   : > { %v869_v62 = vpop.xlane.xlu1 %868 }
 0x549   : > { %v870_v63 = vsub.f32 %v864_v53, %v869_v62  ;;  %v1470_v53 = vld [vmem:[%s5086_s6 + $0x28] sm:$0xff] }
 0x54b   : > { %v871_v1 = vmul.f32 1.442695, %v870_v63 }
 0x54d   : > { %v4161_v2 = vpop.eup %4160  ;;  %4164 = vpow2.f32 %v871_v1 }
 0x54e   : > { %v1038_v3 = vsel %vm627_vm2, %v4161_v2, 0.0 }
 0x54f   : > { %1039 = vadd.xlane.f32.xlu1 %v1038_v3  ;;  %v1567_v3 = vld [vmem:[%s5087_s7 + $0x10] sm:$0xff] }
 0x551   : > { %v4163_v5 = vpop.eup %4162 }
 0x552   : > { %v1203_v6 = vsel %vm627_vm2, %v4163_v5, 0.0 }
 0x553   : > { %1204 = vadd.xlane.f32.xlu0 %v1203_v6  ;;  %v1566_v6 = vld [vmem:[%s5087_s7 + $0x8] sm:$0xff] }
 0x55a   : > { %v4165_v7 = vpop.eup %4164 }
 0x55b   : > { %v873_v8 = vsel %vm627_vm2, %v4165_v7, 0.0 }
 0x55c   : > { %874 = vadd.xlane.f32.xlu0 %v873_v8 }
 0x560   : > { %878 = vrot.lane.b32.xlu1 %v4465_v13, %s5051_s17  ;;  %s5064_s17 = smov 8  }
 0x564   : > { %1208 = vrot.lane.b32.xlu1 %v4465_v13, %s5049_s23  ;;  %s5091_s23 = smov 80  }
 0x572   : > { %1043 = vrot.lane.b32.xlu0 %v4465_v13, %s5050_s26  ;;  %s5090_s26 = smov 120  }
 0x5d8   : > { %v1040_v9 = vpop.xlane.xlu1 %1039 }
 0x5dc   : > { %v879_v10 = vpop.permute.xlu1 %878  ;;  %v1205_v11 = vpop.xlane.xlu0 %1204 }
 0x5dd   : > { %3857 = vmatpush3.msra.mxu1 %v879_v10  ;;  %v1465_v10 = vld [vmem:[%s5086_s6] sm:$0xff] }
 0x5de   : > { %3866 = vmatprep.subr.mxu1 %v4278_v4 }
 0x5e0   : > { %v1209_v21 = vpop.permute.xlu1 %1208 }
 0x5e5   : > { %v875_v12 = vpop.xlane.xlu0 %874 }
 0x5e6   : > { %4166 = vrcp.f32 %v875_v12 }
 0x5e7   : > { %4168 = vrcp.f32 %v1040_v9  ;;  %v1466_v9 = vld [vmem:[%s5086_s6 + $0x8] sm:$0xff] }
 0x5e8   : > { %4170 = vrcp.f32 %v1205_v11 }
 0x5e9   : > { %v1044_v18 = vpop.permute.xlu0 %1043 }
 0x5f3   : > { %v4167_v14 = vpop.eup %4166 }
 0x5f4   : > { %v877_v15 = vmul.f32 %v4167_v14, %v4165_v7  ;;  %v4169_v17 = vpop.eup %4168  ;;  %v1565_v7 = vld [vmem:[%s5087_s7] sm:$0xff] }
 0x5f5   : > { %v1042_v13 = vmul.f32 %v4169_v17, %v4161_v2  ;;  %v4171_v20 = vpop.eup %4170  ;;  %v1568_v2 = vld [vmem:[%s5087_s7 + $0x18] sm:$0xff] }
 0x5f6   : > { %3859 = vmatmul.mubr.msk.f32.vlgmr.msra.gmra.mxu1 %vm627_vm2, %v877_v15  ;;  %v1207_v23 = vmul.f32 %v4171_v20, %v4163_v5 }
 0x5f7   : > { %3867 = vmatpush3.msra.mxu1 %v1044_v18  ;;  %3868 = vmatprep.mubr.msk.f32.mxu1 %vm4279_vm1, %v4278_v4 }
 0x5f8   : > { %3876 = vmatprep.subr.mxu1 %v4278_v4 }
 0x5fa   : > { %3869 = vmatmul.mubr.msk.f32.vlgmr.msra.gmra.mxu1 %vm627_vm2, %v1042_v13 }
 0x5fb   : > { %3877 = vmatpush3.msra.mxu1 %v1209_v21  ;;  %3878 = vmatprep.mubr.msk.f32.mxu1 %vm4279_vm1, %v4278_v4 }
 0x5fc   : > { %3892 = vmatprep.subr.mxu1 %v4278_v4 }
 0x5fe   : > { %3879 = vmatmul.mubr.msk.f32.vlgmr.msra.gmra.mxu1 %vm627_vm2, %v1207_v23 }
 0x5ff   : > { %3900 = vmatprep.mubr.msk.f32.mxu1 %vm4279_vm1, %v4278_v4  ;;  %3893 = vmatpush3.msra.mxu1 %v1390_v48 }
 0x600   : > { %3894 = vmatprep.subr.mxu1 %v4278_v4 }
 0x601   : > { %3895 = vmatpush3.msra.mxu1 %v1389_v49 }
 0x602   : > { %3896 = vmatprep.subr.mxu1 %v4278_v4 }
 0x6b6   : > { %v950_v28 = vpop.f32.mrf.mxu1 }
 0x6b7   : > { %1285 = vrot.lane.b32.xlu1 %v950_v28, %s5064_s17  ;;  %v527_v28 = vand.u32 127, %v524_v16  ;;  %s5096_s17 = smov 48  }
 0x6b8   : > { %v3860_v29 = vpop.f32.mrf.mxu1 }
 0x6b9   : > { %vm528_vm6 = vcmp.ge.s32.totalorder %v4486_v19, %v527_v28  ;;  %v4294_v29 = vmov -1e+09  }
 0x6ba   : > { %v1115_v30 = vpop.f32.mrf.mxu1 }
 0x6bb   : > { %1289 = vrot.lane.b32.xlu1 %v1115_v30, %s5062_s27  ;;  %s5093_s27 = smov 72   ;;  %v529_v30 = vsel %vm528_vm6, 0.0, %v4294_v29 }
 0x6bc   : > { %v3870_v31 = vpop.f32.mrf.mxu1 }
 0x6be   : > { %v1280_v32 = vpop.f32.mrf.mxu1 }
 0x6bf   : > { %1293 = vrot.lane.b32.xlu0 %v1280_v32, %s5060_s25  ;;  %s5094_s25 = smov 104  }
 0x6c0   : > { %v3880_v33 = vpop.f32.mrf.mxu1 }
 0x6de   : > { %1559 = vadd.xlane.f32.xlu0 %v1558_v42 }
 0x729   : > { %v1286_v34 = vpop.permute.xlu1 %1285 }
 0x72a   : > { %v1296_v36 = vsel %vm627_vm2, %v4525_v50, %v1286_v34  ;;  %v1387_v50 = vld [vmem:[%s5085_s5] sm:$0xff] }
 0x72d   : > { %v1290_v35 = vpop.permute.xlu1 %1289 }
 0x72e   : > { %v1298_v37 = vsel %vm1297_vm3, %v1296_v36, %v1290_v35 }
 0x731   : > { %v1294_v38 = vpop.permute.xlu0 %1293 }
 0x732   : > { %v1300_v39 = vsel %vm1299_vm4, %v1298_v37, %v1294_v38 }
 0x733   : > { %3890 = vmatmul.mubr.msk.f32.vlgmr.msra.gmra.mxu0 %vm532_vm0, %v1300_v39 }
 0x734   : > { %3919 = vmatprep.mubr.msk.f32.mxu0 %vm4279_vm1, %v4278_v4  ;;  %3904 = vmatpush3.msra.mxu0 %v1472_v51 }
 0x735   : > { %3905 = vmatprep.subr.mxu0 %v4278_v4 }
 0x736   : > { %3906 = vmatpush3.msra.mxu0 %v1471_v52 }
 0x737   : > { %3907 = vmatprep.subr.mxu0 %v4278_v4 }
 0x738   : > { %3908 = vmatpush3.msra.mxu0 %v1470_v53 }
 0x739   : > { %3909 = vmatprep.subr.mxu0 %v4278_v4 }
 0x73a   : > { %3910 = vmatpush3.msra.mxu0 %v1469_v54 }
 0x73b   : > { %3911 = vmatprep.subr.mxu0 %v4278_v4 }
 0x73c   : > { %3912 = vmatpush3.msra.mxu0 %v1468_v55 }
 0x73d   : > { %3913 = vmatprep.subr.mxu0 %v4278_v4 }
 0x73e   : > { %3914 = vmatpush3.msra.mxu0 %v1467_v56 }
 0x73f   : > { %3915 = vmatprep.subr.mxu0 %v4278_v4 }
 0x740   : > { %3916 = vmatpush3.msra.mxu0 %v1466_v9 }
 0x741   : > { %3917 = vmatprep.subr.mxu0 %v4278_v4 }
 0x742   : > { %3918 = vmatpush3.msra.mxu0 %v1465_v10 }
 0x743   : > { %3943 = vmatprep.subr.mxu0 %v4278_v4 }
 0x767   : > { %v1560_v57 = vpop.xlane.xlu0 %1559 }
 0x768   : > { %v1561_v60 = vmul.f32 0.03125, %v1560_v57 }
 0x76a   : > { %v1562_v62 = vadd.f32 1e-06, %v1561_v60 }
 0x7f3   : > { %v1374_v43 = vpop.f32.mrf.mxu0 }
 0x7f4   : > { %v4587_v44 = vadd.f32 %v1374_v43, %v4434_v0  ;;  %v1388_v0 = vld [vmem:[%s5085_s5 + $0x8] sm:$0xff] }
 0x7f5   : > { %v3891_v45 = vpop.f32.mrf.mxu0  ;;  %3897 = vmatpush3.msra.mxu1 %v1388_v0 }
 0x7f6   : > { %v1379_v46 = vmul.f32 %v4587_v44, %v4587_v44  ;;  %3898 = vmatprep.subr.mxu1 %v4278_v4 }
 0x7f7   : > { %3899 = vmatpush3.msra.mxu1 %v1387_v50 }
 0x7f8   : > { %v1380_v47 = vsel %vm532_vm0, %v1379_v46, 0.0  ;;  %3922 = vmatprep.subr.mxu1 %v4278_v4 }
 0x7f9   : > { %1381 = vadd.xlane.f32.xlu1 %v1380_v47 }
 0x882   : > { %v1382_v58 = vpop.xlane.xlu1 %1381 }
 0x883   : > { %v1383_v59 = vmul.f32 0.03125, %v1382_v58 }
 0x885   : > { %v1384_v61 = vadd.f32 1e-06, %v1383_v59 }
 0x887   : > { %4172 = vrsqrt.f32 %v1384_v61 }
 0x888   : > { %4174 = vrsqrt.f32 %v1562_v62 }
 0x894   : > { %v4173_v63 = vpop.eup %4172 }
 0x895   : > { %v1386_v1 = vmul.f32 %v4173_v63, %v4587_v44  ;;  %v4175_v5 = vpop.eup %4174 }
 0x896   : > { %v1564_v8 = vmul.f32 %v4175_v5, %v4581_v40 }
 0x897   : > { %3901 = vmatmul.mubr.msk.f32.vlgmr.msra.gmra.mxu1 %vm532_vm0, %v1386_v1 }
 0x898   : > { %3923 = vmatpush3.msra.mxu1 %v1568_v2  ;;  %3930 = vmatprep.mubr.msk.f32.mxu1 %vm4279_vm1, %v4278_v4 }
 0x899   : > { %3924 = vmatprep.subr.mxu1 %v4278_v4 }
 0x89a   : > { %3925 = vmatpush3.msra.mxu1 %v1567_v3 }
 0x89b   : > { %3926 = vmatprep.subr.mxu1 %v4278_v4 }
 0x89c   : > { %3927 = vmatpush3.msra.mxu1 %v1566_v6 }
 0x89d   : > { %3928 = vmatprep.subr.mxu1 %v4278_v4 }
 0x89e   : > { %3929 = vmatpush3.msra.mxu1 %v1565_v7 }
 0x89f   : > { %3931 = vmatmul.mubr.msk.f32.vlgmr.msra.gmra.mxu1 %vm532_vm0, %v1564_v8  ;;  %3933 = vmatprep.subr.mxu1 %v4278_v4 }
 0x8a0   : > { %3935 = vmatprep.mubr.msk.f32.mxu1 %vm4279_vm1, %v4278_v4 }
 0x957   : > { %v1460_v11 = vpop.f32.mrf.mxu1 }
 0x958   : > { %v1464_v12 = vmax.f32 %v1460_v11, 0.0 }
 0x959   : > { %v3902_v14 = vpop.f32.mrf.mxu1 }
 0x95a   : > { %3920 = vmatmul.mubr.msk.f32.vlgmr.msra.gmra.mxu0 %vm1473_vm5, %v1464_v12 }
 0x95b   : > { %3945 = vmatprep.mubr.msk.f32.mxu0 %vm4279_vm1, %v4278_v4 }
 0x95f   : > { %v4667_v15 = vpop.f32.mrf.mxu1 }
 0x960   : > { %1808 = vrot.lane.b32.xlu1 %v4667_v15, %s5088_s30  ;;  %1643 = vrot.lane.b32.xlu0 %v4667_v15, %s5089_s16 }
 0x961   : > { %v3932_v17 = vpop.f32.mrf.mxu1 }
 0x964   : > { %1806 = vrot.lane.b32.xlu1 %v4667_v15, %s5090_s26  ;;  %1973 = vrot.lane.b32.xlu0 %v4667_v15, %s5091_s23 }
 0x968   : > { %1971 = vrot.lane.b32.xlu1 %v4667_v15, %s5092_s20  ;;  %2138 = vrot.lane.b32.xlu0 %v4667_v15, %s5093_s27 }
 0x96c   : > { %2136 = vrot.lane.b32.xlu1 %v4667_v15, %s5094_s25 }
 0x9d2   : > { %v1809_v18 = vpop.permute.xlu1 %1808  ;;  %v1644_v13 = vpop.permute.xlu0 %1643 }
 0x9d3   : > { %3934 = vmatpush3.xpose.msk.msra.mxu1 %vm627_vm2, %v1644_v13  ;;  %3944 = vmatpush3.xpose.msk.msra.mxu0 %vm627_vm2, %v1809_v18 }
 0x9d4   : > { %3953 = vmatprep.subr.mxu0 %v4278_v4  ;;  %3938 = vmatprep.subr.mxu1 %v4278_v4 }
 0x9d6   : > { %v1807_v20 = vpop.permute.xlu1 %1806  ;;  %3936 = vmatmul.mubr.msk.f32.vlgmr.msra.gmra.mxu1 %vm627_vm2, %v4667_v15  ;;  %v1974_v21 = vpop.permute.xlu0 %1973 }
 0x9d7   : > { %3946 = vmatmul.mubr.msk.f32.vlgmr.msra.gmra.mxu0 %vm627_vm2, %v1807_v20  ;;  %3940 = vmatprep.mubr.msk.f32.mxu1 %vm4279_vm1, %v4278_v4 }
 0x9d8   : > { %3954 = vmatpush3.xpose.msk.msra.mxu0 %vm627_vm2, %v1974_v21  ;;  %3955 = vmatprep.mubr.msk.f32.mxu0 %vm4279_vm1, %v4278_v4 }
 0x9d9   : > { %3963 = vmatprep.subr.mxu0 %v4278_v4 }
 0x9da   : > { %v1972_v23 = vpop.permute.xlu1 %1971  ;;  %v2139_v24 = vpop.permute.xlu0 %2138 }
 0x9db   : > { %3956 = vmatmul.mubr.msk.f32.vlgmr.msra.gmra.mxu0 %vm627_vm2, %v1972_v23  ;;  %v2319_v23 = vld [vmem:[%s5099_s8 + $0x18] sm:$0xff] }
 0x9dc   : > { %3964 = vmatpush3.xpose.msk.msra.mxu0 %vm627_vm2, %v2139_v24  ;;  %3965 = vmatprep.mubr.msk.f32.mxu0 %vm4279_vm1, %v4278_v4  ;;  %v2318_v24 = vld [vmem:[%s5099_s8 + $0x10] sm:$0xff] }
 0x9dd   : > { %3973 = vmatprep.subr.mxu0 %v4278_v4 }
 0x9de   : > { %v2137_v25 = vpop.permute.xlu1 %2136 }
 0x9df   : > { %3966 = vmatmul.mubr.msk.f32.vlgmr.msra.gmra.mxu0 %vm627_vm2, %v2137_v25  ;;  %v2317_v25 = vld [vmem:[%s5099_s8 + $0x8] sm:$0xff] }
 0x9e0   : > { %3981 = vmatprep.mubr.msk.f32.mxu0 %vm4279_vm1, %v4278_v4  ;;  %3974 = vmatpush3.msra.mxu0 %v2319_v23 }
 0x9e1   : > { %3975 = vmatprep.subr.mxu0 %v4278_v4 }
 0x9e2   : > { %3976 = vmatpush3.msra.mxu0 %v2318_v24 }
 0x9e3   : > { %3977 = vmatprep.subr.mxu0 %v4278_v4 }
 0x9e4   : > { %3978 = vmatpush3.msra.mxu0 %v2317_v25 }
 0x9e5   : > { %3979 = vmatprep.subr.mxu0 %v4278_v4 }
 0xa1a   : > { %v4704_v26 = vpop.f32.mrf.mxu0 }
 0xa1c   : > { %v3921_v27 = vpop.f32.mrf.mxu0 }
 0xa96   : > { %v1715_v31 = vpop.f32.mrf.mxu1 }
 0xa97   : > { %v1716_v32 = vadd.f32 %v1715_v31, %v529_v30  ;;  %v1880_v33 = vpop.f32.mrf.mxu0 }
 0xa98   : > { %v1881_v34 = vadd.f32 %v1880_v33, %v529_v30  ;;  %v3937_v35 = vpop.f32.mrf.mxu1  ;;  %v1547_v33 = vadd.f32 %v4704_v26, %v4587_v44 }
 0xa99   : > { %v3947_v36 = vpop.f32.mrf.mxu0  ;;  %v1719_v37 = vsel %vm627_vm2, %v1716_v32, -inf }
 0xa9a   : > { %1720 = vmax.xlane.f32.xlu0 %v1719_v37  ;;  %v1884_v38 = vsel %vm627_vm2, %v1881_v34, -inf  ;;  %v2316_v36 = vld [vmem:[%s5099_s8] sm:$0xff] }
 0xa9b   : > { %1885 = vmax.xlane.f32.xlu1 %v1884_v38  ;;  %v2045_v39 = vpop.f32.mrf.mxu0  ;;  %3980 = vmatpush3.msra.mxu0 %v2316_v36 }
 0xa9c   : > { %v2046_v41 = vadd.f32 %v2045_v39, %v529_v30  ;;  %3995 = vmatprep.subr.mxu0 %v4278_v4 }
 0xa9d   : > { %v3957_v42 = vpop.f32.mrf.mxu0 }
 0xa9e   : > { %v2049_v16 = vsel %vm627_vm2, %v2046_v41, -inf }
 0xa9f   : > { %2050 = vmax.xlane.f32.xlu0 %v2049_v16  ;;  %v2210_v19 = vpop.f32.mrf.mxu0  ;;  %v2482_v16 = vld [vmem:[%s5033_s10 + $0x18] sm:$0xff] }
 0xaa0   : > { %v2211_v43 = vadd.f32 %v2210_v19, %v529_v30 }
 0xaa1   : > { %v3967_v45 = vpop.f32.mrf.mxu0 }
 0xaa2   : > { %v2214_v46 = vsel %vm627_vm2, %v2211_v43, -inf  ;;  %v2480_v45 = vld [vmem:[%s5033_s10 + $0x8] sm:$0xff] }
 0xaa3   : > { %2215 = vmax.xlane.f32.xlu0 %v2214_v46  ;;  %v2479_v46 = vld [vmem:[%s5033_s10] sm:$0xff] }
 0xb23   : > { %v1721_v47 = vpop.xlane.xlu0 %1720 }
 0xb24   : > { %v1722_v48 = vsub.f32 %v1716_v32, %v1721_v47  ;;  %v1886_v49 = vpop.xlane.xlu1 %1885 }
 0xb25   : > { %v1887_v0 = vsub.f32 %v1881_v34, %v1886_v49  ;;  %v1548_v34 = vmul.f32 %v1547_v33, %v1547_v33 }
 0xb26   : > { %v1723_v50 = vmul.f32 1.442695, %v1722_v48 }
 0xb27   : > { %v1888_v51 = vmul.f32 1.442695, %v1887_v0  ;;  %v1549_v35 = vsel %vm532_vm0, %v1548_v34, 0.0 }
 0xb28   : > { %4176 = vpow2.f32 %v1723_v50  ;;  %v2051_v52 = vpop.xlane.xlu0 %2050 }
 0xb29   : > { %4178 = vpow2.f32 %v1888_v51  ;;  %v2052_v53 = vsub.f32 %v2046_v41, %v2051_v52 }
 0xb2b   : > { %v2053_v54 = vmul.f32 1.442695, %v2052_v53 }
 0xb2c   : > { %v2216_v61 = vpop.xlane.xlu0 %2215 }
 0xb2d   : > { %4180 = vpow2.f32 %v2053_v54  ;;  %v2217_v62 = vsub.f32 %v2211_v43, %v2216_v61  ;;  %v2481_v43 = vld [vmem:[%s5033_s10 + $0x10] sm:$0xff] }
 0xb2f   : > { %v2218_v63 = vmul.f32 1.442695, %v2217_v62 }
 0xb31   : > { %4182 = vpow2.f32 %v2218_v63 }
 0xb35   : > { %v4177_v55 = vpop.eup %4176 }
 0xb36   : > { %v4179_v56 = vpop.eup %4178  ;;  %v1725_v57 = vsel %vm627_vm2, %v4177_v55, 0.0 }
 0xb37   : > { %1726 = vadd.xlane.f32.xlu0 %v1725_v57  ;;  %v1890_v58 = vsel %vm627_vm2, %v4179_v56, 0.0  ;;  %v2404_v57 = vld [vmem:[%s5032_s9 + $0x10] sm:$0xff] }
 0xb38   : > { %1891 = vadd.xlane.f32.xlu1 %v1890_v58  ;;  %v2402_v58 = vld [vmem:[%s5032_s9] sm:$0xff] }
 0xb3a   : > { %v4181_v59 = vpop.eup %4180 }
 0xb3b   : > { %v2055_v60 = vsel %vm627_vm2, %v4181_v59, 0.0 }
 0xb3c   : > { %2056 = vadd.xlane.f32.xlu0 %v2055_v60 }
 0xb3e   : > { %v4183_v1 = vpop.eup %4182 }
 0xb3f   : > { %v2220_v2 = vsel %vm627_vm2, %v4183_v1, 0.0 }
 0xb49   : > { %1895 = vrot.lane.b32.xlu1 %v4667_v15, %s5095_s24 }
 0xb4d   : > { %2060 = vrot.lane.b32.xlu1 %v4667_v15, %s5096_s17  ;;  %s5102_s17 = smov 24  }
 0xb52   : > { %1730 = vrot.lane.b32.xlu0 %v4667_v15, %s5097_s0  ;;  %s5100_s0 = smov 8  }
 0xb71   : > { %2221 = vadd.xlane.f32.xlu1 %v2220_v2 }
 0xb82   : > { %2225 = vrot.lane.b32.xlu1 %v4667_v15, %s5098_s1  ;;  %s5101_s1 = smov 16  }
 0xbc0   : > { %v1727_v3 = vpop.xlane.xlu0 %1726 }
 0xbc1   : > { %4184 = vrcp.f32 %v1727_v3  ;;  %v1892_v5 = vpop.xlane.xlu1 %1891 }
 0xbc2   : > { %4186 = vrcp.f32 %v1892_v5 }
 0xbc5   : > { %v2057_v6 = vpop.xlane.xlu0 %2056  ;;  %v1896_v9 = vpop.permute.xlu1 %1895 }
 0xbc6   : > { %4188 = vrcp.f32 %v2057_v6 }
 0xbc9   : > { %v1731_v7 = vpop.permute.xlu0 %1730  ;;  %v2061_v15 = vpop.permute.xlu1 %2060 }
 0xbca   : > { %3939 = vmatpush3.msra.mxu1 %v1731_v7 }
 0xbcb   : > { %3948 = vmatprep.subr.mxu1 %v4278_v4 }
 0xbce   : > { %v4185_v8 = vpop.eup %4184 }
 0xbcf   : > { %v1729_v10 = vmul.f32 %v4185_v8, %v4177_v55  ;;  %v4187_v11 = vpop.eup %4186 }
 0xbd0   : > { %v1894_v12 = vmul.f32 %v4187_v11, %v4179_v56  ;;  %v2405_v56 = vld [vmem:[%s5032_s9 + $0x18] sm:$0xff] }
 0xbd1   : > { %3941 = vmatmul.mubr.msk.f32.vlgmr.msra.gmra.mxu1 %vm627_vm2, %v1729_v10 }
 0xbd2   : > { %3949 = vmatpush3.msra.mxu1 %v1896_v9  ;;  %3950 = vmatprep.mubr.msk.f32.mxu1 %vm4279_vm1, %v4278_v4 }
 0xbd3   : > { %3958 = vmatprep.subr.mxu1 %v4278_v4  ;;  %v4189_v14 = vpop.eup %4188 }
 0xbd4   : > { %v2059_v17 = vmul.f32 %v4189_v14, %v4181_v59 }
 0xbd5   : > { %3951 = vmatmul.mubr.msk.f32.vlgmr.msra.gmra.mxu1 %vm627_vm2, %v1894_v12 }
 0xbd6   : > { %3959 = vmatpush3.msra.mxu1 %v2061_v15  ;;  %3960 = vmatprep.mubr.msk.f32.mxu1 %vm4279_vm1, %v4278_v4 }
 0xbd7   : > { %3968 = vmatprep.subr.mxu1 %v4278_v4 }
 0xbd9   : > { %3961 = vmatmul.mubr.msk.f32.vlgmr.msra.gmra.mxu1 %vm627_vm2, %v2059_v17 }
 0xbda   : > { %3970 = vmatprep.mubr.msk.f32.mxu1 %vm4279_vm1, %v4278_v4 }
 0xbfa   : > { %v2222_v18 = vpop.xlane.xlu1 %2221 }
 0xbfb   : > { %4190 = vrcp.f32 %v2222_v18 }
 0xbfe   : > { %v2226_v13 = vpop.permute.xlu1 %2225 }
 0xbff   : > { %3969 = vmatpush3.msra.mxu1 %v2226_v13 }
 0xc00   : > { %3984 = vmatprep.subr.mxu1 %v4278_v4 }
 0xc08   : > { %v4191_v20 = vpop.eup %4190 }
 0xc09   : > { %v2224_v21 = vmul.f32 %v4191_v20, %v4183_v1 }
 0xc0b   : > { %3971 = vmatmul.mubr.msk.f32.vlgmr.msra.gmra.mxu1 %vm627_vm2, %v2224_v21 }
 0xc0c   : > { %3992 = vmatprep.mubr.msk.f32.mxu1 %vm4279_vm1, %v4278_v4  ;;  %3985 = vmatpush3.msra.mxu1 %v2405_v56 }
 0xc0d   : > { %3986 = vmatprep.subr.mxu1 %v4278_v4 }
 0xc0e   : > { %3987 = vmatpush3.msra.mxu1 %v2404_v57 }
 0xc0f   : > { %3988 = vmatprep.subr.mxu1 %v4278_v4 }
 0xc91   : > { %v1802_v27 = vpop.f32.mrf.mxu1 }
 0xc93   : > { %v3942_v28 = vpop.f32.mrf.mxu1 }
 0xc95   : > { %v1967_v29 = vpop.f32.mrf.mxu1 }
 0xc96   : > { %2302 = vrot.lane.b32.xlu0 %v1967_v29, %s5100_s0 }
 0xc97   : > { %v3952_v30 = vpop.f32.mrf.mxu1 }
 0xc99   : > { %v2132_v31 = vpop.f32.mrf.mxu1 }
 0xc9a   : > { %2306 = vrot.lane.b32.xlu1 %v2132_v31, %s5101_s1 }
 0xc9b   : > { %v3962_v32 = vpop.f32.mrf.mxu1 }
 0xcbe   : > { %1550 = vadd.xlane.f32.xlu1 %v1549_v35 }
 0xccb   : > { %v2297_v37 = vpop.f32.mrf.mxu1 }
 0xccc   : > { %2310 = vrot.lane.b32.xlu0 %v2297_v37, %s5102_s17 }
 0xccd   : > { %v3972_v38 = vpop.f32.mrf.mxu1 }
 0xd08   : > { %v2303_v39 = vpop.permute.xlu0 %2302 }
 0xd09   : > { %v2313_v42 = vsel %vm627_vm2, %v1802_v27, %v2303_v39 }
 0xd0c   : > { %v2307_v41 = vpop.permute.xlu1 %2306 }
 0xd0d   : > { %v2314_v44 = vsel %vm1297_vm3, %v2313_v42, %v2307_v41 }
 0xd3e   : > { %v2311_v26 = vpop.permute.xlu0 %2310 }
 0xd3f   : > { %v2315_v19 = vsel %vm1299_vm4, %v2314_v44, %v2311_v26 }
 0xd40   : > { %3982 = vmatmul.mubr.msk.f32.vlgmr.msra.gmra.mxu0 %vm532_vm0, %v2315_v19 }
 0xd41   : > { %3996 = vmatpush3.msra.mxu0 %v2482_v16  ;;  %4003 = vmatprep.mubr.msk.f32.mxu0 %vm4279_vm1, %v4278_v4 }
 0xd42   : > { %3997 = vmatprep.subr.mxu0 %v4278_v4 }
 0xd43   : > { %3998 = vmatpush3.msra.mxu0 %v2481_v43 }
 0xd44   : > { %3999 = vmatprep.subr.mxu0 %v4278_v4 }
 0xd45   : > { %4000 = vmatpush3.msra.mxu0 %v2480_v45 }
 0xd46   : > { %4001 = vmatprep.subr.mxu0 %v4278_v4 }
 0xd47   : > { %v1551_v47 = vpop.xlane.xlu1 %1550  ;;  %4002 = vmatpush3.msra.mxu0 %v2479_v46 }
 0xd48   : > { %v1552_v48 = vmul.f32 0.03125, %v1551_v47  ;;  %4016 = vmatprep.subr.mxu0 %v4278_v4 }
 0xd4a   : > { %v1553_v49 = vadd.f32 1e-06, %v1552_v48 }
 0xd4c   : > { %4192 = vrsqrt.f32 %v1553_v49 }
 0xd59   : > { %v4193_v0 = vpop.eup %4192 }
 0xd5a   : > { %v1555_v50 = vmul.f32 %v4193_v0, %v1547_v33 }
 0xd5c   : > { %4004 = vmatmul.mubr.msk.f32.vlgmr.msra.gmra.mxu0 %vm532_vm0, %v1555_v50 }
 0xd5d   : > { %4018 = vmatprep.mubr.msk.f32.mxu0 %vm4279_vm1, %v4278_v4 }
 0xe00   : > { %v2389_v51 = vpop.f32.mrf.mxu0 }
 0xe01   : > { %v4788_v52 = vadd.f32 %v2389_v51, %v4581_v40  ;;  %v2403_v40 = vld [vmem:[%s5032_s9 + $0x8] sm:$0xff] }
 0xe02   : > { %v3983_v53 = vpop.f32.mrf.mxu0  ;;  %3989 = vmatpush3.msra.mxu1 %v2403_v40 }
 0xe03   : > { %v2394_v54 = vmul.f32 %v4788_v52, %v4788_v52  ;;  %3990 = vmatprep.subr.mxu1 %v4278_v4 }
 0xe04   : > { %3991 = vmatpush3.msra.mxu1 %v2402_v58 }
 0xe05   : > { %v2395_v55 = vsel %vm532_vm0, %v2394_v54, 0.0  ;;  %4006 = vmatprep.subr.mxu1 %v4278_v4 }
 0xe06   : > { %2396 = vadd.xlane.f32.xlu0 %v2395_v55 }
 0xe1c   : > { %v4808_v59 = vpop.f32.mrf.mxu0 }
 0xe1d   : > { %2721 = vrot.lane.b32.xlu0 %v4808_v59, %s5090_s26 }
 0xe1e   : > { %v4005_v60 = vpop.f32.mrf.mxu0 }
 0xe8f   : > { %v2397_v61 = vpop.xlane.xlu0 %2396 }
 0xe90   : > { %v2398_v62 = vmul.f32 0.03125, %v2397_v61 }
 0xe92   : > { %v2399_v63 = vadd.f32 1e-06, %v2398_v62 }
 0xe93   : > { %v2722_v1 = vpop.permute.xlu0 %2721 }
 0xe94   : > { %4194 = vrsqrt.f32 %v2399_v63  ;;  %4017 = vmatpush3.xpose.msk.msra.mxu0 %vm627_vm2, %v2722_v1 }
 0xe95   : > { %4026 = vmatprep.subr.mxu0 %v4278_v4 }
 0xea1   : > { %v4195_v2 = vpop.eup %4194 }
 0xea2   : > { %v2401_v3 = vmul.f32 %v4195_v2, %v4788_v52 }
 0xea4   : > { %3993 = vmatmul.mubr.msk.f32.vlgmr.msra.gmra.mxu1 %vm532_vm0, %v2401_v3  ;;  %v3232_v3 = vld [vmem:[%s5034_s11 + $0x18] sm:$0xff] }
 0xea5   : > { %4007 = vmatpush3.xpose.msk.msra.mxu1 %vm627_vm2, %v4808_v59  ;;  %4008 = vmatprep.mubr.msk.f32.mxu1 %vm4279_vm1, %v4278_v4 }
 0xea6   : > { %4011 = vmatprep.subr.mxu1 %v4278_v4 }
 0xf64   : > { %v2475_v5 = vpop.f32.mrf.mxu1 }
 0xf65   : > { %2719 = vrot.lane.b32.xlu1 %v2475_v5, %s5090_s26  ;;  %2884 = vrot.lane.b32.xlu0 %v2475_v5, %s5092_s20  ;;  %s507_s26 = sand.u32 1, %s4268_s19  }
 0xf66   : > { %4009 = vmatmul.mubr.msk.f32.vlgmr.msra.gmra.mxu1 %vm627_vm2, %v2475_v5  ;;  %v3994_v6 = vpop.f32.mrf.mxu1  ;;  %s3562_s5 = scalar_lea.sflag [#allocation3], %s507_s26 }
 0xf67   : > { %4013 = vmatprep.mubr.msk.f32.mxu1 %vm4279_vm1, %v4278_v4  ;;  %v3230_v6 = vld [vmem:[%s5034_s11 + $0x8] sm:$0xff] }
 0xf69   : > { %2886 = vrot.lane.b32.xlu1 %v4808_v59, %s5092_s20  ;;  %3049 = vrot.lane.b32.xlu0 %v2475_v5, %s5094_s25  ;;  %v3231_v5 = vld [vmem:[%s5034_s11 + $0x10] sm:$0xff]  ;;  %s3711_s20 = sshll.u32 %s4397_s22, 7  ;;  %s4295_s22 = smov [#allocation2]  }
 0xf6a   : > { %s4220_s2 = sshll.u32 %s4295_s22, 4  ;;  %s4221_s2 = int_to_ptr.vmem [resolvable:$false] %s4220_s2 }
 0xf6b   : > { %s4222_s3 = scalar_lea.vmem %s4221_s2, 256 }
 0xf6d   : > { %3051 = vrot.lane.b32.xlu1 %v4808_v59, %s5094_s25 }
 0xfd7   : > { %v2720_v7 = vpop.permute.xlu1 %2719  ;;  %v2885_v9 = vpop.permute.xlu0 %2884 }
 0xfd8   : > { %4019 = vmatmul.mubr.msk.f32.vlgmr.msra.gmra.mxu0 %vm627_vm2, %v2720_v7  ;;  %v3229_v7 = vld [vmem:[%s5034_s11] sm:$0xff] }
 0xfd9   : > { %4028 = vmatprep.mubr.msk.f32.mxu0 %vm4279_vm1, %v4278_v4 }
 0xfdb   : > { %v2887_v8 = vpop.permute.xlu1 %2886  ;;  %v3050_v11 = vpop.permute.xlu0 %3049 }
 0xfdc   : > { %4027 = vmatpush3.xpose.msk.msra.mxu0 %vm627_vm2, %v2887_v8 }
 0xfdd   : > { %4036 = vmatprep.subr.mxu0 %v4278_v4 }
 0xfdf   : > { %v3052_v10 = vpop.permute.xlu1 %3051  ;;  %4029 = vmatmul.mubr.msk.f32.vlgmr.msra.gmra.mxu0 %vm627_vm2, %v2885_v9 }
 0xfe0   : > { %4037 = vmatpush3.xpose.msk.msra.mxu0 %vm627_vm2, %v3052_v10  ;;  %4038 = vmatprep.mubr.msk.f32.mxu0 %vm4279_vm1, %v4278_v4 }
 0xfe1   : > { %4046 = vmatprep.subr.mxu0 %v4278_v4 }
 0xfe3   : > { %4039 = vmatmul.mubr.msk.f32.vlgmr.msra.gmra.mxu0 %vm627_vm2, %v3050_v11 }
 0xfe4   : > { %4054 = vmatprep.mubr.msk.f32.mxu0 %vm4279_vm1, %v4278_v4  ;;  %4047 = vmatpush3.msra.mxu0 %v3232_v3 }
 0xfe5   : > { %4048 = vmatprep.subr.mxu0 %v4278_v4 }
 0xfe6   : > { %4049 = vmatpush3.msra.mxu0 %v3231_v5 }
 0xfe7   : > { %4050 = vmatprep.subr.mxu0 %v4278_v4 }
 0xfe8   : > { %4051 = vmatpush3.msra.mxu0 %v3230_v6 }
 0xfe9   : > { %4052 = vmatprep.subr.mxu0 %v4278_v4 }
 0xfea   : > { %4053 = vmatpush3.msra.mxu0 %v3229_v7 }
 0xfeb   : > { %4068 = vmatprep.subr.mxu0 %v4278_v4 }
0x1026   : > { %v2628_v12 = vpop.f32.mrf.mxu1 }
0x1027   : > { %v2629_v14 = vadd.f32 %v2628_v12, %v4489_v22 }
0x1028   : > { %v4010_v15 = vpop.f32.mrf.mxu1 }
0x1029   : > { %v2632_v17 = vsel %vm627_vm2, %v2629_v14, -inf }
0x102a   : > { %2633 = vmax.xlane.f32.xlu1 %v2632_v17 }
0x103b   : > { %2643 = vrot.lane.b32.xlu1 %v4808_v59, %s5089_s16 }
0x1098   : > { %v2793_v18 = vpop.f32.mrf.mxu0 }
0x1099   : > { %v2794_v13 = vadd.f32 %v2793_v18, %v4489_v22 }
0x109a   : > { %v4020_v20 = vpop.f32.mrf.mxu0 }
0x109b   : > { %v2797_v21 = vsel %vm627_vm2, %v2794_v13, -inf }
0x109c   : > { %2798 = vmax.xlane.f32.xlu0 %v2797_v21 }
0x109f   : > { %v2958_v23 = vpop.f32.mrf.mxu0 }
0x10a0   : > { %v2959_v24 = vadd.f32 %v2958_v23, %v4489_v22 }
0x10a1   : > { %v4030_v25 = vpop.f32.mrf.mxu0 }
0x10a2   : > { %v2962_v27 = vsel %vm627_vm2, %v2959_v24, -inf }
0x10a3   : > { %2963 = vmax.xlane.f32.xlu0 %v2962_v27  ;;  %v3123_v28 = vpop.f32.mrf.mxu0 }
0x10a4   : > { %v3124_v29 = vadd.f32 %v3123_v28, %v4489_v22 }
0x10a5   : > { %v4040_v30 = vpop.f32.mrf.mxu0 }
0x10a6   : > { %v3127_v31 = vsel %vm627_vm2, %v3124_v29, -inf  ;;  %v3317_v30 = vld [vmem:[%s5035_s12 + $0x10] sm:$0xff] }
0x10a7   : > { %3128 = vmax.xlane.f32.xlu0 %v3127_v31  ;;  %v3315_v31 = vld [vmem:[%s5035_s12] sm:$0xff] }
0x10b3   : > { %v2634_v32 = vpop.xlane.xlu1 %2633 }
0x10b4   : > { %v2635_v33 = vsub.f32 %v2629_v14, %v2634_v32  ;;  %v3400_v32 = vld [vmem:[%s5036_s13 + $0x38] sm:$0xff] }
0x10b6   : > { %v2636_v34 = vmul.f32 1.442695, %v2635_v33  ;;  %v3399_v33 = vld [vmem:[%s5036_s13 + $0x30] sm:$0xff] }
0x10b7   : > { %v2644_v35 = vpop.permute.xlu1 %2643 }
0x10b8   : > { %4196 = vpow2.f32 %v2636_v34  ;;  %4012 = vmatpush3.msra.mxu1 %v2644_v35  ;;  %v3398_v34 = vld [vmem:[%s5036_s13 + $0x28] sm:$0xff]  ;;  %v3397_v35 = vld [vmem:[%s5036_s13 + $0x20] sm:$0xff] }
0x10b9   : > { %4021 = vmatprep.subr.mxu1 %v4278_v4 }
0x10c5   : > { %v4197_v36 = vpop.eup %4196 }
0x10c6   : > { %v2638_v37 = vsel %vm627_vm2, %v4197_v36, 0.0 }
0x10c7   : > { %2639 = vadd.xlane.f32.xlu1 %v2638_v37  ;;  %v3395_v37 = vld [vmem:[%s5036_s13 + $0x10] sm:$0xff] }
0x1125   : > { %v2799_v38 = vpop.xlane.xlu0 %2798 }
0x1126   : > { %v2800_v39 = vsub.f32 %v2794_v13, %v2799_v38 }
0x1128   : > { %v2801_v41 = vmul.f32 1.442695, %v2800_v39 }
0x112a   : > { %4198 = vpow2.f32 %v2801_v41 }
0x112c   : > { %v2964_v22 = vpop.xlane.xlu0 %2963 }
0x112d   : > { %v2965_v42 = vsub.f32 %v2959_v24, %v2964_v22 }
0x112f   : > { %v2966_v44 = vmul.f32 1.442695, %v2965_v42 }
0x1130   : > { %v3129_v26 = vpop.xlane.xlu0 %3128 }
0x1131   : > { %4200 = vpow2.f32 %v2966_v44  ;;  %v3130_v16 = vsub.f32 %v3124_v29, %v3129_v26  ;;  %v3318_v29 = vld [vmem:[%s5035_s12 + $0x18] sm:$0xff]  ;;  %v3394_v44 = vld [vmem:[%s5036_s13 + $0x8] sm:$0xff]  ;;  %v3393_v26 = vld [vmem:[%s5036_s13] sm:$0xff] }
0x1133   : > { %v3131_v19 = vmul.f32 1.442695, %v3130_v16 }
0x1135   : > { %4202 = vpow2.f32 %v3131_v19 }
0x1137   : > { %v4199_v43 = vpop.eup %4198 }
0x1138   : > { %v2803_v45 = vsel %vm627_vm2, %v4199_v43, 0.0 }
0x1139   : > { %2804 = vadd.xlane.f32.xlu0 %v2803_v45 }
0x113e   : > { %v4201_v46 = vpop.eup %4200 }
0x113f   : > { %v2968_v47 = vsel %vm627_vm2, %v4201_v46, 0.0 }
0x1140   : > { %2969 = vadd.xlane.f32.xlu1 %v2968_v47 }
0x1142   : > { %v4203_v48 = vpop.eup %4202 }
0x1143   : > { %v3133_v49 = vsel %vm627_vm2, %v4203_v48, 0.0 }
0x1144   : > { %3134 = vadd.xlane.f32.xlu0 %v3133_v49 }
0x1150   : > { %v2640_v0 = vpop.xlane.xlu1 %2639 }
0x1151   : > { %4204 = vrcp.f32 %v2640_v0  ;;  %2973 = vrot.lane.b32.xlu1 %v4808_v59, %s5091_s23  ;;  %v3486_v0 = vld [vmem:[%s5037_s14 + $0x18] sm:$0xff]  ;;  %s3659_s23 = sshll.u32 %s507_s26, 3 }
0x1155   : > { %3138 = vrot.lane.b32.xlu1 %v4808_v59, %s5093_s27  ;;  %s509_s27 = scalar_lea.vmem [#allocation2], %s3659_s23 }
0x1156   : > { %s3575_s25 = sshll.u32 %s509_s27, 4  ;;  %s4983_s25 = int_to_ptr.vmem [resolvable:$true] %s3575_s25 }
0x1157   : > { %s4216_s6 = scalar_lea.vmem %s4983_s25, 128  ;;  %p4223_p0 = scmp.lt.s32.totalorder %s4983_s25, %s4221_s2 }
0x1158   : > { %p4217_p11 = scmp.ne.s32.totalorder %s4983_s25, %s4216_s6  ;;  %p4224_p1 = scmp.lt.s32.totalorder %s4222_s3, %s4216_s6 }
0x115a   : > { %2808 = vrot.lane.b32.xlu0 %v4808_v59, %s5088_s30  ;;  %p4218_p12 = pnand %p4217_p11, %p4414_p5  ;;  %p4225_p2 = por %p4224_p1, %p4223_p0 }
0x115c   : > { %p4219_p13 = pneg %p4218_p12 }
0x115e   : > { %v4205_v50 = vpop.eup %4204  ;;  %p4226_p3 = pnand %p4225_p2, %p4219_p13 }
0x115f   : > { %v2642_v51 = vmul.f32 %v4205_v50, %v4197_v36  ;;  %v3396_v36 = vld [vmem:[%s5036_s13 + $0x18] sm:$0xff]  ;;  %v3485_v50 = vld [vmem:[%s5037_s14 + $0x10] sm:$0xff] }
0x1161   : > { %4014 = vmatmul.mubr.msk.f32.vlgmr.msra.gmra.mxu1 %vm627_vm2, %v2642_v51  ;;  %v3484_v51 = vld [vmem:[%s5037_s14 + $0x8] sm:$0xff] }
0x1162   : > { %4023 = vmatprep.mubr.msk.f32.mxu1 %vm4279_vm1, %v4278_v4 }
0x11c2   : > { %v2805_v53 = vpop.xlane.xlu0 %2804 }
0x11c3   : > { %4206 = vrcp.f32 %v2805_v53  ;;  %v3483_v53 = vld [vmem:[%s5037_s14] sm:$0xff] }
0x11c9   : > { %v2970_v54 = vpop.xlane.xlu1 %2969 }
0x11ca   : > { %4208 = vrcp.f32 %v2970_v54 }
0x11cd   : > { %v3135_v55 = vpop.xlane.xlu0 %3134  ;;  %v2974_v58 = vpop.permute.xlu1 %2973 }
0x11ce   : > { %4210 = vrcp.f32 %v3135_v55 }
0x11d0   : > { %v4207_v56 = vpop.eup %4206 }
0x11d1   : > { %v2809_v57 = vpop.permute.xlu0 %2808  ;;  %v2807_v40 = vmul.f32 %v4207_v56, %v4199_v43  ;;  %v3139_v61 = vpop.permute.xlu1 %3138 }
0x11d2   : > { %4022 = vmatpush3.msra.mxu1 %v2809_v57 }
0x11d3   : > { %4024 = vmatmul.mubr.msk.f32.vlgmr.msra.gmra.mxu1 %vm627_vm2, %v2807_v40  ;;  %4031 = vmatprep.subr.mxu1 %v4278_v4 }
0x11d4   : > { %4032 = vmatpush3.msra.mxu1 %v2974_v58  ;;  %4033 = vmatprep.mubr.msk.f32.mxu1 %vm4279_vm1, %v4278_v4 }
0x11d5   : > { %4041 = vmatprep.subr.mxu1 %v4278_v4 }
0x11d7   : > { %v4209_v59 = vpop.eup %4208 }
0x11d8   : > { %v2972_v60 = vmul.f32 %v4209_v59, %v4201_v46 }
0x11da   : > { %4034 = vmatmul.mubr.msk.f32.vlgmr.msra.gmra.mxu1 %vm627_vm2, %v2972_v60 }
0x11db   : > { %v4211_v62 = vpop.eup %4210  ;;  %4042 = vmatpush3.msra.mxu1 %v3139_v61  ;;  %4043 = vmatprep.mubr.msk.f32.mxu1 %vm4279_vm1, %v4278_v4 }
0x11dc   : > { %v3137_v63 = vmul.f32 %v4211_v62, %v4203_v48  ;;  %4057 = vmatprep.subr.mxu1 %v4278_v4 }
0x11de   : > { %4044 = vmatmul.mubr.msk.f32.vlgmr.msra.gmra.mxu1 %vm627_vm2, %v3137_v63 }
0x11df   : > { %4065 = vmatprep.mubr.msk.f32.mxu1 %vm4279_vm1, %v4278_v4  ;;  %4058 = vmatpush3.msra.mxu1 %v3318_v29 }
0x11e0   : > { %4059 = vmatprep.subr.mxu1 %v4278_v4 }
0x11e1   : > { %4060 = vmatpush3.msra.mxu1 %v3317_v30 }
0x11e2   : > { %4061 = vmatprep.subr.mxu1 %v4278_v4 }
0x1221   : > { %v2715_v1 = vpop.f32.mrf.mxu1 }
0x1223   : > { %v4015_v2 = vpop.f32.mrf.mxu1 }
0x1293   : > { %v2880_v8 = vpop.f32.mrf.mxu1 }
0x1294   : > { %3215 = vrot.lane.b32.xlu1 %v2880_v8, %s5100_s0 }
0x1295   : > { %v4025_v9 = vpop.f32.mrf.mxu1 }
0x129a   : > { %v3045_v10 = vpop.f32.mrf.mxu1 }
0x129b   : > { %3219 = vrot.lane.b32.xlu0 %v3045_v10, %s5101_s1 }
0x129c   : > { %v4035_v11 = vpop.f32.mrf.mxu1 }
0x129e   : > { %v3210_v12 = vpop.f32.mrf.mxu1 }
0x129f   : > { %3223 = vrot.lane.b32.xlu1 %v3210_v12, %s5102_s17  ;;  %s4981_s17 = scalar_lea.hbm %s5038_s15, %s3711_s20 }
0x12a0   : > { %v4045_v14 = vpop.f32.mrf.mxu1 }
0x1306   : > { %v3216_v15 = vpop.permute.xlu1 %3215 }
0x1307   : > { %v3226_v18 = vsel %vm627_vm2, %v2715_v1, %v3216_v15 }
0x130d   : > { %v3220_v17 = vpop.permute.xlu0 %3219 }
0x130e   : > { %v3227_v13 = vsel %vm1297_vm3, %v3226_v18, %v3220_v17 }
0x1311   : > { %v3224_v20 = vpop.permute.xlu1 %3223 }
0x1312   : > { %v3228_v21 = vsel %vm1299_vm4, %v3227_v13, %v3224_v20 }
0x1313   : > { %4055 = vmatmul.mubr.msk.f32.vlgmr.msra.gmra.mxu0 %vm532_vm0, %v3228_v21 }
0x1314   : > { %4084 = vmatprep.mubr.msk.f32.mxu0 %vm4279_vm1, %v4278_v4  ;;  %4069 = vmatpush3.msra.mxu0 %v3400_v32 }
0x1315   : > { %4070 = vmatprep.subr.mxu0 %v4278_v4 }
0x1316   : > { %4071 = vmatpush3.msra.mxu0 %v3399_v33 }
0x1317   : > { %4072 = vmatprep.subr.mxu0 %v4278_v4 }
0x1318   : > { %4073 = vmatpush3.msra.mxu0 %v3398_v34 }
0x1319   : > { %4074 = vmatprep.subr.mxu0 %v4278_v4 }
0x131a   : > { %4075 = vmatpush3.msra.mxu0 %v3397_v35 }
0x131b   : > { %4076 = vmatprep.subr.mxu0 %v4278_v4 }
0x131c   : > { %4077 = vmatpush3.msra.mxu0 %v3396_v36 }
0x131d   : > { %4078 = vmatprep.subr.mxu0 %v4278_v4 }
0x131e   : > { %4079 = vmatpush3.msra.mxu0 %v3395_v37 }
0x131f   : > { %4080 = vmatprep.subr.mxu0 %v4278_v4 }
0x1320   : > { %4081 = vmatpush3.msra.mxu0 %v3394_v44 }
0x1321   : > { %4082 = vmatprep.subr.mxu0 %v4278_v4 }
0x1322   : > { %4083 = vmatpush3.msra.mxu0 %v3393_v26 }
0x13d3   : > { %v3302_v23 = vpop.f32.mrf.mxu0 }
0x13d4   : > { %v3306_v24 = vadd.f32 %v3302_v23, %v4788_v52  ;;  %v3316_v52 = vld [vmem:[%s5035_s12 + $0x8] sm:$0xff] }
0x13d5   : > { %v4056_v25 = vpop.f32.mrf.mxu0  ;;  %4062 = vmatpush3.msra.mxu1 %v3316_v52 }
0x13d6   : > { %v3307_v27 = vmul.f32 %v3306_v24, %v3306_v24  ;;  %4063 = vmatprep.subr.mxu1 %v4278_v4 }
0x13d7   : > { %4064 = vmatpush3.msra.mxu1 %v3315_v31 }
0x13d8   : > { %v3308_v28 = vsel %vm532_vm0, %v3307_v27, 0.0  ;;  %4087 = vmatprep.subr.mxu1 %v4278_v4 }
0x13d9   : > { %3309 = vadd.xlane.f32.xlu0 %v3308_v28 }
0x1462   : > { %v3310_v38 = vpop.xlane.xlu0 %3309 }
0x1463   : > { %v3311_v39 = vmul.f32 0.03125, %v3310_v38 }
0x1465   : > { %v3312_v41 = vadd.f32 1e-06, %v3311_v39 }
0x1467   : > { %4212 = vrsqrt.f32 %v3312_v41 }
0x1474   : > { %v4213_v22 = vpop.eup %4212 }
0x1475   : > { %v3314_v42 = vmul.f32 %v4213_v22, %v3306_v24 }
0x1477   : > { %4066 = vmatmul.mubr.msk.f32.vlgmr.msra.gmra.mxu1 %vm532_vm0, %v3314_v42 }
0x1478   : > { %4095 = vmatprep.mubr.msk.f32.mxu1 %vm4279_vm1, %v4278_v4  ;;  %4088 = vmatpush3.msra.mxu1 %v3486_v0 }
0x1479   : > { %4089 = vmatprep.subr.mxu1 %v4278_v4 }
0x147a   : > { %4090 = vmatpush3.msra.mxu1 %v3485_v50 }
0x147b   : > { %4091 = vmatprep.subr.mxu1 %v4278_v4 }
0x147c   : > { %4092 = vmatpush3.msra.mxu1 %v3484_v51 }
0x147d   : > { %4093 = vmatprep.subr.mxu1 %v4278_v4 }
0x147e   : > { %4094 = vmatpush3.msra.mxu1 %v3483_v53 }
0x1537   : > { %v3388_v16 = vpop.f32.mrf.mxu1 }
0x1538   : > { %v3392_v19 = vmax.f32 %v3388_v16, 0.0 }
0x1539   : > { %v4067_v43 = vpop.f32.mrf.mxu1 }
0x153a   : > { %4085 = vmatmul.mubr.msk.f32.vlgmr.msra.gmra.mxu0 %vm1473_vm5, %v3392_v19 }
0x15fa   : > { %v3470_v45 = vpop.f32.mrf.mxu0 }
0x15fb   : > { %v3474_v46 = vadd.f32 %v3470_v45, %v3306_v24 }
0x15fc   : > { %v4086_v47 = vpop.f32.mrf.mxu0 }
0x15fd   : > { %v3475_v48 = vmul.f32 %v3474_v46, %v3474_v46 }
0x15ff   : > { %v3476_v49 = vsel %vm532_vm0, %v3475_v48, 0.0 }
0x1600   : > { %3477 = vadd.xlane.f32.xlu1 %v3476_v49 }
0x1689   : > { %v3478_v54 = vpop.xlane.xlu1 %3477 }
0x168a   : > { %v3479_v55 = vmul.f32 0.03125, %v3478_v54 }
0x168c   : > { %v3480_v56 = vadd.f32 1e-06, %v3479_v55 }
0x168e   : > { %4214 = vrsqrt.f32 %v3480_v56 }
0x169b   : > { %v4215_v57 = vpop.eup %4214 }
0x169c   : > { %v3482_v40 = vmul.f32 %v4215_v57, %v3474_v46 }
0x169e   : > { %4096 = vmatmul.mubr.msk.f32.vlgmr.msra.gmra.mxu1 %vm532_vm0, %v3482_v40 }
0x175e   : > { %v3556_v4 = vpop.f32.mrf.mxu1 }
0x175f   : > { %3560 = vst.msk [vmem:[%s509_s27] sm:$0xff] %vm532_vm0, %v3556_v4 }
0x1760   : > { %v4097_v58 = vpop.f32.mrf.mxu1 }
0x1761   : > { %4229 = shalt.err (!%p4226_p3)
}
0x1762   : > { %s4230_s4 = scalar_lea.hbm %s4981_s17, 128  ;;  %s4234_s8 = scalar_lea.hbm %s5038_s15, 256 }
0x1763   : > { %p4231_p4 = scmp.ne.s32.totalorder %s4981_s17, %s4230_s4  ;;  %p4235_p9 = scmp.lt.s32.totalorder %s4981_s17, %s5038_s15 }
0x1764   : > { %p4236_p10 = scmp.lt.s32.totalorder %s4234_s8, %s4230_s4 }
0x1765   : > { %p4232_p7 = pnand %p4231_p4, %p4414_p5 }
0x1766   : > { %p4237_p11 = por %p4236_p10, %p4235_p9 }
0x1767   : > { %p4233_p8 = pneg %p4232_p7 }
0x1769   : > { %p4238_p12 = pnand %p4237_p11, %p4233_p8 }
0x176b   : > { %4241 = shalt.err (!%p4238_p12)
}
0x176c   : > { %4098 = dma.vmem_to_hbm [thread:$0]  (%p4414_p5), %s4983_s25, 128, %s4981_s17, %s3562_s5  }
0x176d PF: > { %p4104_p13 = scmp.ge.s32.totalorder %s4276_s21, 2  ;;  %s3587_s26 = sand.u32 1, %s4264_s18  }
0x176e   : > { %s3588_s23 = scalar_lea.sflag [#allocation3], %s3587_s26 }
0x176f   : > { %p4101_p0 = pnand %p4104_p13, %p4418_p6 }
0x1771   : > { %p4102_p1 = pneg %p4101_p0 }
0x1773   : > { %4259 = dma.done.wait (%p4102_p1), %s3588_s23, 128  }
0x1774   : > { %4261 = vsyncadd (%p4102_p1), %s3588_s23, 4294967168  ;;  %s5103_s21 = sld [smem:[#allocation6_spill]]  ;;  %s5106_s18 = smov %s4268_s19 }
0x1775   : > { %s5104_s20 = sld [smem:[#allocation5_spill]] }
0x1776   : > { %s5105_s27 = sld [smem:[#allocation7_spill]] }
0x177a   : > { %p25_p2 = scmp.ge.s32.totalorder %s5103_s21, 4  }
0x177b   : > { %s5107_s19 = smov %s5104_s20 }
0x177c   : > { %s5108_s20 = smov %s5105_s27  ;;  %27 = sbr.rel (!%p25_p2) target bundleno = 13 (0xd), region = 121 }
0x1781   :  { %3593 = vsyncpa [#allocation3], 1 }
0x1782   :  { %3595 = vsyncpa [#allocation3 + $0x1], 1 }

</bundles_post_ra>
